<compile_context>
chip_gen: v7x
topology: tpu7x:2x2x1
jax: 0.10.0
libtpu: 0.0.40
codegen_flags: <defaults>
</compile_context>

<pallas_src>
import jax
import jax.numpy as jnp
from jax import lax
from jax.experimental import pallas as pl
from jax.experimental.pallas import tpu as pltpu


def _round_up(x, m):
    return (x + m - 1) // m * m


def _pick_hw_tile(hw, cap):
    """Largest multiple-of-128 divisor of hw that is <= cap (None if none)."""
    best = None
    t = 128
    while t <= min(cap, hw):
        if hw % t == 0:
            best = t
        t += 128
    return best


def _pick_batch_tile(n, cap):
    """Divisor of n that is a multiple of 8 and <= cap; prefers >= 2 grid steps
    on the parallel axis when n allows it (v7x megacore). Falls back to the
    full batch (always a legal block)."""
    upper = min(cap, n // 2) if n >= 16 else min(cap, n)
    for t in range(max(upper, 1), 0, -1):
        if n % t == 0 and t % 8 == 0:
            return t
    return n


def _forward_kernel(x_ref, wct_ref, wp_ref, wnt_ref, logits_ref, feat_ref,
                    acc_ref):
    s = pl.program_id(1)
    tile_n = x_ref.shape[0]

    @pl.when(s == 0)
    def _init():
        acc_ref[...] = jnp.zeros_like(acc_ref)

    # Fused dual-branch 1x1 conv over channels as one batched MXU matmul:
    #   (tile_n, mid2, C) x (tile_n, C, tile_hw) -> (tile_n, mid2, tile_hw)
    # Spatial stays on lanes; the tiny channel dim is the contraction.
    wct_b = jnp.broadcast_to(wct_ref[...], (tile_n,) + wct_ref.shape)
    h = lax.dot_general(
        wct_b, x_ref[...],
        dimension_numbers=(((2,), (1,)), ((0,), (0,))),
        preferred_element_type=jnp.float32)
    h = jnp.maximum(h, 0.0)
    # Partial global-average-pool: sum this spatial tile (lane-axis reduce on
    # the otherwise idle XLU); the 1/HW scale is pre-folded into wp_ref.
    acc_ref[...] += jnp.sum(h, axis=2)

    @pl.when(s == pl.num_programs(1) - 1)
    def _finalize():
        pooled = acc_ref[...]                           # (tile_n, mid2)
        # Block-diagonal projection == per-branch linear + ReLU + concat.
        feats = jnp.maximum(
            jnp.dot(pooled, wp_ref[...], preferred_element_type=jnp.float32),
            0.0)                                        # (tile_n, feat_p)
        feat_ref[...] = feats
        # Cosine head: padded feature lanes are exactly zero, so they do not
        # perturb the norm.  rsqrt runs on the EUP slot.
        sumsq = jnp.sum(feats * feats, axis=1, keepdims=True)
        f_n = feats * lax.rsqrt(jnp.maximum(sumsq, 1e-24))
        logits_ref[...] = jnp.dot(f_n, wnt_ref[...],
                                  preferred_element_type=jnp.float32)


def prepare_params(params, hw):
    """One-time weight prep (hoisted out of the forward path).

    Fuses the two branch conv weights, builds the block-diagonal projection
    with the 1/HW pooling scale folded in, and row-normalizes / sigma-scales /
    transposes / pads the cosine-head weight.
    """
    wc1, wc2 = params["wc1"], params["wc2"]            # (C, mid)
    wp1, wp2 = params["wp1"], params["wp2"]            # (mid, out_dim)
    fcw, sigma = params["fc_weight"], params["sigma"]  # (nbc, feat), (1,)

    C, mid = wc1.shape
    out_dim = wp1.shape[1]
    mid2, feat_dim = 2 * mid, 2 * out_dim
    nb_classes = fcw.shape[0]
    feat_p = _round_up(feat_dim, 128)
    nbc_p = _round_up(nb_classes, 128)

    # Fused conv weight, transposed to (mid2, C): h = wct @ x per sample.
    wct = jnp.concatenate([wc1, wc2], axis=1).T.astype(jnp.float32)

    # Block-diagonal projection with the global-average-pool 1/HW folded in
    # (ReLU follows the matmul, so scaling the weight is mathematically equal).
    wp_bd = jnp.zeros((mid2, feat_p), jnp.float32)
    wp_bd = wp_bd.at[:mid, :out_dim].set(wp1 / hw)
    wp_bd = wp_bd.at[mid:, out_dim:feat_dim].set(wp2 / hw)

    # Cosine head: normalize rows once, fold sigma, pad, pre-transpose so the
    # in-kernel matmul is plain (tile_n, feat_p) @ (feat_p, nbc_p).
    w_norm = fcw * lax.rsqrt(
        jnp.maximum(jnp.sum(fcw * fcw, axis=1, keepdims=True), 1e-24))
    wnt = jnp.zeros((feat_p, nbc_p), jnp.float32)
    wnt = wnt.at[:feat_dim, :nb_classes].set((sigma.reshape(()) * w_norm).T)

    return {"wct": wct, "wp_bd": wp_bd, "wnt": wnt,
            "hw": hw, "nb_classes": nb_classes, "feat_dim": feat_dim}


def multi_branch_forward(x_nchw, prepped, *, max_batch_tile=32, max_hw_tile=512):
    """x_nchw: (N, C, H, W) float32.  Returns {'logits', 'features'}."""
    N, C, H, W = x_nchw.shape
    HW = H * W
    assert HW == prepped["hw"], "prepare_params built for a different spatial size"

    wct, wp_bd, wnt = prepped["wct"], prepped["wp_bd"], prepped["wnt"]
    mid2 = wct.shape[0]
    feat_p = wp_bd.shape[1]
    nbc_p = wnt.shape[1]
    nb_classes = prepped["nb_classes"]
    feat_dim = prepped["feat_dim"]

    # (N, C, H, W) -> (N, C, HW): contiguous reshape, no transpose / HBM pass.
    x3 = x_nchw.reshape(N, C, HW)

    # Spatial tiling: multiples of 128 (lane-dense x tiles).  Pad HW only if it
    # has no usable 128-multiple divisor AND is too large for a single block;
    # zero spatial padding dies at the ReLU and 1/HW uses the real HW.
    hw_p = HW
    tile_hw = _pick_hw_tile(HW, max(max_hw_tile, 128))
    if tile_hw is None:
        if HW <= 4096:
            tile_hw = HW                       # full extent: always a legal block
        else:
            hw_p = _round_up(HW, 128)
            x3 = jnp.pad(x3, ((0, 0), (0, 0), (0, hw_p - HW)))
            tile_hw = _pick_hw_tile(hw_p, max(max_hw_tile, 128))

    # Batch tiling: keep the f32 conv intermediate (tile_n, mid2, tile_hw)
    # under ~8 MiB so everything stays comfortably inside every generation's
    # scoped-VMEM budget (v7x: 64 MiB physical).
    h_budget = 8 * 1024 * 1024
    cap_n = max(8, h_budget // max(1, mid2 * tile_hw * 4))
    tile_n = _pick_batch_tile(N, min(max_batch_tile, cap_n))

    grid = (N // tile_n, hw_p // tile_hw)

    def build_and_call(single_buffer_weights):
        def wspec(shape):
            # Constant-index weights are fetched once; single-buffer them so
            # the pipeline does not allocate two VMEM copies of each.
            if single_buffer_weights:
                return pl.BlockSpec(shape, lambda b, s: (0, 0),
                                    pipeline_mode=pl.Buffered(1))
            return pl.BlockSpec(shape, lambda b, s: (0, 0))

        in_specs = [
            pl.BlockSpec((tile_n, C, tile_hw), lambda b, s: (b, 0, s)),
            wspec((mid2, C)),
            wspec((mid2, feat_p)),
            wspec((feat_p, nbc_p)),
        ]
        out_specs = (
            pl.BlockSpec((tile_n, nbc_p), lambda b, s: (b, 0)),
            pl.BlockSpec((tile_n, feat_p), lambda b, s: (b, 0)),
        )
        return pl.pallas_call(
            _forward_kernel,
            out_shape=(
                jax.ShapeDtypeStruct((N, nbc_p), jnp.float32),
                jax.ShapeDtypeStruct((N, feat_p), jnp.float32),
            ),
            grid=grid,
            in_specs=in_specs,
            out_specs=out_specs,
            scratch_shapes=[pltpu.VMEM((tile_n, mid2), jnp.float32)],
            compiler_params=pltpu.CompilerParams(
                dimension_semantics=("parallel", "arbitrary"),
                # 48 MiB fits every generation (v7x has 64 MiB physical VMEM);
                # the chosen tiles use far less.
                vmem_limit_bytes=48 * 1024 * 1024),
        )(x3, wct, wp_bd, wnt)

    try:
        logits_p, feats_p = build_and_call(True)
    except Exception:
        # pl.Buffered(1) unavailable on this jax build -> default buffering.
        logits_p, feats_p = build_and_call(False)

    return {"logits": logits_p[:, :nb_classes],
            "features": feats_p[:, :feat_dim]}


def _reference_forward(x_nchw, params):
    """Plain-JAX f32 reference for correctness check."""
    N, C, H, W = x_nchw.shape
    x = jnp.transpose(x_nchw, (0, 2, 3, 1)).reshape(N, H * W, C)

    def branch(wc, wp):
        h = jnp.maximum(jnp.einsum("nsc,cm->nsm", x, wc), 0.0)
        pooled = jnp.mean(h, axis=1)
        return jnp.maximum(pooled @ wp, 0.0)

    features = jnp.concatenate(
        [branch(params["wc1"], params["wp1"]),
         branch(params["wc2"], params["wp2"])], axis=1)
    eps = 1e-12
    f_norm = features / jnp.maximum(
        jnp.linalg.norm(features, axis=1, keepdims=True), eps)
    w = params["fc_weight"]
    w_norm = w / jnp.maximum(jnp.linalg.norm(w, axis=1, keepdims=True), eps)
    logits = params["sigma"][0] * (f_norm @ w_norm.T)
    return logits, features


def _init_params(key, C, mid, out_dim, nb_classes):
    feature_dim = 2 * out_dim
    k1, k2, k3, k4, k5 = jax.random.split(key, 5)
    stdv = 1.0 / jnp.sqrt(feature_dim)   # CosineLinear reset_parameters
    return {
        "wc1": 0.1 * jax.random.normal(k1, (C, mid), jnp.float32),
        "wc2": 0.1 * jax.random.normal(k2, (C, mid), jnp.float32),
        "wp1": 0.1 * jax.random.normal(k3, (mid, out_dim), jnp.float32),
        "wp2": 0.1 * jax.random.normal(k4, (mid, out_dim), jnp.float32),
        "fc_weight": jax.random.uniform(
            k5, (nb_classes, feature_dim), jnp.float32, -stdv, stdv),
        "sigma": jnp.ones((1,), jnp.float32),   # CosineLinear sigma init = 1
    }


if __name__ == "__main__":
    key = jax.random.PRNGKey(0)
    kx, kp = jax.random.split(key)

    # small shapes: batch=2, channels=4, spatial=16x16, per-branch out_dim=32
    N, C, H, W = 2, 4, 16, 16
    mid, out_dim, nb_classes = 32, 32, 10

    x = jax.random.normal(kx, (N, C, H, W), jnp.float32)
    params = _init_params(kp, C, mid, out_dim, nb_classes)

    # One-time weight prep (hoisted out of the forward path).
    prepped = prepare_params(params, hw=H * W)

    # max_hw_tile=128 so the toy 16x16 input still exercises the multi-step
    # spatial-reduction pipeline (production default is 512).
    out = multi_branch_forward(x, prepped, max_hw_tile=128)
    jax.block_until_ready(out)

    ref_logits, ref_features = _reference_forward(x, params)
    assert out["logits"].shape == (N, nb_classes)
    assert out["features"].shape == (N, 2 * out_dim)
    # Everything is f32 end-to-end, but the MXU's default matmul precision may
    # round intermediates, so keep a conservative tolerance.
    assert jnp.allclose(out["logits"], ref_logits, atol=2e-2, rtol=2e-2)
    assert jnp.allclose(out["features"], ref_features, atol=2e-2, rtol=2e-2)

    print("KERNEL_OK")
</pallas_src>

<mosaic_0001>
module attributes {stable_mosaic.version = 11 : i64} {
  func.func @_forward_kernel(%arg0: i32, %arg1: i32, %arg2: memref<2x4x128xf32, #tpu.memory_space<vmem>>, %arg3: memref<64x4xf32, #tpu.memory_space<vmem>>, %arg4: memref<64x128xf32, #tpu.memory_space<vmem>>, %arg5: memref<128x128xf32, #tpu.memory_space<vmem>>, %arg6: memref<2x128xf32, #tpu.memory_space<vmem>>, %arg7: memref<2x128xf32, #tpu.memory_space<vmem>>, %arg8: memref<2x64xf32, #tpu.memory_space<vmem>>) attributes {dimension_semantics = [#tpu.dimension_semantics<parallel>, #tpu.dimension_semantics<arbitrary>], iteration_bounds = array<i64: 1, 2>, scalar_prefetch = 0 : i64, scratch_operands = 1 : i64, tpu.core_type = #tpu.core_type<tc>, window_params = [{transform_indices = @transform_0, window_bounds = array<i64: 2, 4, 128>}, {pipeline_mode = #tpu.pipeline_mode<synchronous>, transform_indices = @transform_1, window_bounds = array<i64: 64, 4>}, {pipeline_mode = #tpu.pipeline_mode<synchronous>, transform_indices = @transform_2, window_bounds = array<i64: 64, 128>}, {pipeline_mode = #tpu.pipeline_mode<synchronous>, transform_indices = @transform_3, window_bounds = array<i64: 128, 128>}, {transform_indices = @transform_4, window_bounds = array<i64: 2, 128>}, {transform_indices = @transform_5, window_bounds = array<i64: 2, 128>}]} {
    %c0_i32 = arith.constant 0 : i32
    %0 = arith.cmpi eq, %arg1, %c0_i32 : i32
    %1 = arith.extui %0 : i1 to i32
    %c0_i32_0 = arith.constant 0 : i32
    %2 = arith.cmpi ne, %1, %c0_i32_0 : i32
    scf.if %2 {
      %cst_12 = arith.constant 0.000000e+00 : f32
      %17 = vector.broadcast %cst_12 : f32 to vector<2x64xf32>
      %c0_13 = arith.constant 0 : index
      %c0_14 = arith.constant 0 : index
      %18 = vector.load %arg8[%c0_13, %c0_14] : memref<2x64xf32, #tpu.memory_space<vmem>>, vector<2x64xf32>
      tpu.vector_store %arg8[%c0_13, %c0_14], %17 {strides = array<i32>} : memref<2x64xf32, #tpu.memory_space<vmem>>, vector<2x64xf32>,
    } else {
    }
    %c0 = arith.constant 0 : index
    %c0_1 = arith.constant 0 : index
    %3 = vector.load %arg3[%c0, %c0_1] : memref<64x4xf32, #tpu.memory_space<vmem>>, vector<64x4xf32>
    %4 = vector.shape_cast %3 : vector<64x4xf32> to vector<1x64x4xf32>
    %5 = vector.broadcast %4 : vector<1x64x4xf32> to vector<2x64x4xf32>
    %c0_2 = arith.constant 0 : index
    %c0_3 = arith.constant 0 : index
    %c0_4 = arith.constant 0 : index
    %6 = vector.load %arg2[%c0_2, %c0_3, %c0_4] : memref<2x4x128xf32, #tpu.memory_space<vmem>>, vector<2x4x128xf32>
    %cst = arith.constant dense<0.000000e+00> : vector<2x64x128xf32>
    %7 = tpu.matmul %5, %6, %cst {dimension_numbers = #tpu.dot_dimension_numbers<[2], [1], [1], [2], [0, 0, 0, 1, 1, 2], [0], [0]>} : vector<2x64x4xf32>, vector<2x4x128xf32>, vector<2x64x128xf32> -> vector<2x64x128xf32>
    %cst_5 = arith.constant 0.000000e+00 : f32
    %8 = vector.broadcast %cst_5 : f32 to vector<2x64x128xf32>
    %9 = arith.maximumf %7, %8 : vector<2x64x128xf32>
    %c0_6 = arith.constant 0 : index
    %c0_7 = arith.constant 0 : index
    %10 = vector.load %arg8[%c0_6, %c0_7] : memref<2x64xf32, #tpu.memory_space<vmem>>, vector<2x64xf32>
    %cst_8 = arith.constant dense<0.000000e+00> : vector<2x64xf32>
    %11 = vector.multi_reduction <add>, %9, %cst_8 [2] : vector<2x64x128xf32> to vector<2x64xf32>
    %12 = arith.addf %10, %11 : vector<2x64xf32>
    %c0_9 = arith.constant 0 : index
    %c0_10 = arith.constant 0 : index
    %13 = vector.load %arg8[%c0_9, %c0_10] : memref<2x64xf32, #tpu.memory_space<vmem>>, vector<2x64xf32>
    tpu.vector_store %arg8[%c0_9, %c0_10], %12 {strides = array<i32>} : memref<2x64xf32, #tpu.memory_space<vmem>>, vector<2x64xf32>,
    %c1_i32 = arith.constant 1 : i32
    %14 = arith.cmpi eq, %arg1, %c1_i32 : i32
    %15 = arith.extui %14 : i1 to i32
    %c0_i32_11 = arith.constant 0 : i32
    %16 = arith.cmpi ne, %15, %c0_i32_11 : i32
    scf.if %16 {
      %c0_12 = arith.constant 0 : index
      %c0_13 = arith.constant 0 : index
      %17 = vector.load %arg8[%c0_12, %c0_13] : memref<2x64xf32, #tpu.memory_space<vmem>>, vector<2x64xf32>
      %c0_14 = arith.constant 0 : index
      %c0_15 = arith.constant 0 : index
      %18 = vector.load %arg4[%c0_14, %c0_15] : memref<64x128xf32, #tpu.memory_space<vmem>>, vector<64x128xf32>
      %cst_16 = arith.constant dense<0.000000e+00> : vector<2x128xf32>
      %19 = tpu.matmul %17, %18, %cst_16 {dimension_numbers = #tpu.dot_dimension_numbers<[1], [0], [0], [1], [0, 0, 1, 1], [], []>} : vector<2x64xf32>, vector<64x128xf32>, vector<2x128xf32> -> vector<2x128xf32>
      %cst_17 = arith.constant 0.000000e+00 : f32
      %20 = vector.broadcast %cst_17 : f32 to vector<2x128xf32>
      %21 = arith.maximumf %19, %20 : vector<2x128xf32>
      %c0_18 = arith.constant 0 : index
      %c0_19 = arith.constant 0 : index
      %22 = vector.load %arg7[%c0_18, %c0_19] : memref<2x128xf32, #tpu.memory_space<vmem>>, vector<2x128xf32>
      tpu.vector_store %arg7[%c0_18, %c0_19], %21 {strides = array<i32>} : memref<2x128xf32, #tpu.memory_space<vmem>>, vector<2x128xf32>,
      %23 = arith.mulf %21, %21 : vector<2x128xf32>
      %cst_20 = arith.constant dense<0.000000e+00> : vector<2xf32>
      %24 = vector.multi_reduction <add>, %23, %cst_20 [1] : vector<2x128xf32> to vector<2xf32>
      %25 = vector.shape_cast %24 : vector<2xf32> to vector<2x1xf32>
      %cst_21 = arith.constant 1.000000e-24 : f32
      %26 = vector.broadcast %cst_21 : f32 to vector<2x1xf32>
      %27 = arith.maximumf %25, %26 : vector<2x1xf32>
      %28 = math.rsqrt %27 : vector<2x1xf32>
      %29 = vector.broadcast %28 : vector<2x1xf32> to vector<2x128xf32>
      %30 = arith.mulf %21, %29 : vector<2x128xf32>
      %c0_22 = arith.constant 0 : index
      %c0_23 = arith.constant 0 : index
      %31 = vector.load %arg5[%c0_22, %c0_23] : memref<128x128xf32, #tpu.memory_space<vmem>>, vector<128x128xf32>
      %cst_24 = arith.constant dense<0.000000e+00> : vector<2x128xf32>
      %32 = tpu.matmul %30, %31, %cst_24 {dimension_numbers = #tpu.dot_dimension_numbers<[1], [0], [0], [1], [0, 0, 1, 1], [], []>} : vector<2x128xf32>, vector<128x128xf32>, vector<2x128xf32> -> vector<2x128xf32>
      %c0_25 = arith.constant 0 : index
      %c0_26 = arith.constant 0 : index
      %33 = vector.load %arg6[%c0_25, %c0_26] : memref<2x128xf32, #tpu.memory_space<vmem>>, vector<2x128xf32>
      tpu.vector_store %arg6[%c0_25, %c0_26], %32 {strides = array<i32>} : memref<2x128xf32, #tpu.memory_space<vmem>>, vector<2x128xf32>,
    } else {
    }
    return
  }
  func.func @transform_0(%arg0: i32, %arg1: i32) -> (i32, i32, i32) {
    %c0_i32 = arith.constant 0 : i32
    %c0_i32_0 = arith.constant 0 : i32
    return %arg0, %c0_i32, %arg1 : i32, i32, i32
  }
  func.func @transform_1(%arg0: i32, %arg1: i32) -> (i32, i32) {
    %c0_i32 = arith.constant 0 : i32
    %c0_i32_0 = arith.constant 0 : i32
    %c0_i32_1 = arith.constant 0 : i32
    return %c0_i32, %c0_i32_0 : i32, i32
  }
  func.func @transform_2(%arg0: i32, %arg1: i32) -> (i32, i32) {
    %c0_i32 = arith.constant 0 : i32
    %c0_i32_0 = arith.constant 0 : i32
    %c0_i32_1 = arith.constant 0 : i32
    return %c0_i32, %c0_i32_0 : i32, i32
  }
  func.func @transform_3(%arg0: i32, %arg1: i32) -> (i32, i32) {
    %c0_i32 = arith.constant 0 : i32
    %c0_i32_0 = arith.constant 0 : i32
    %c0_i32_1 = arith.constant 0 : i32
    return %c0_i32, %c0_i32_0 : i32, i32
  }
  func.func @transform_4(%arg0: i32, %arg1: i32) -> (i32, i32) {
    %c0_i32 = arith.constant 0 : i32
    %c0_i32_0 = arith.constant 0 : i32
    return %arg0, %c0_i32 : i32, i32
  }
  func.func @transform_5(%arg0: i32, %arg1: i32) -> (i32, i32) {
    %c0_i32 = arith.constant 0 : i32
    %c0_i32_0 = arith.constant 0 : i32
    return %arg0, %c0_i32 : i32, i32
  }
}

module attributes {stable_mosaic.version = 11 : i64} {
  func.func @_forward_kernel(%arg0: i32, %arg1: i32, %arg2: memref<2x4x128xf32, #tpu.memory_space<vmem>>, %arg3: memref<64x4xf32, #tpu.memory_space<vmem>>, %arg4: memref<64x128xf32, #tpu.memory_space<vmem>>, %arg5: memref<128x128xf32, #tpu.memory_space<vmem>>, %arg6: memref<2x128xf32, #tpu.memory_space<vmem>>, %arg7: memref<2x128xf32, #tpu.memory_space<vmem>>, %arg8: memref<2x64xf32, #tpu.memory_space<vmem>>) attributes {dimension_semantics = [#tpu.dimension_semantics<parallel>, #tpu.dimension_semantics<arbitrary>], iteration_bounds = array<i64: 1, 2>, scalar_prefetch = 0 : i64, scratch_operands = 1 : i64, tpu.core_type = #tpu.core_type<tc>, window_params = [{transform_indices = @transform_0, window_bounds = array<i64: 2, 4, 128>}, {pipeline_mode = #tpu.pipeline_mode<synchronous>, transform_indices = @transform_1, window_bounds = array<i64: 64, 4>}, {pipeline_mode = #tpu.pipeline_mode<synchronous>, transform_indices = @transform_2, window_bounds = array<i64: 64, 128>}, {pipeline_mode = #tpu.pipeline_mode<synchronous>, transform_indices = @transform_3, window_bounds = array<i64: 128, 128>}, {transform_indices = @transform_4, window_bounds = array<i64: 2, 128>}, {transform_indices = @transform_5, window_bounds = array<i64: 2, 128>}]} {
    %c0_i32 = arith.constant 0 : i32
    %0 = arith.cmpi eq, %arg1, %c0_i32 : i32
    %1 = arith.extui %0 : i1 to i32
    %c0_i32_0 = arith.constant 0 : i32
    %2 = arith.cmpi ne, %1, %c0_i32_0 : i32
    scf.if %2 {
      %cst_12 = arith.constant 0.000000e+00 : f32
      %17 = vector.broadcast %cst_12 : f32 to vector<2x64xf32>
      %c0_13 = arith.constant 0 : index
      %c0_14 = arith.constant 0 : index
      %18 = vector.load %arg8[%c0_13, %c0_14] : memref<2x64xf32, #tpu.memory_space<vmem>>, vector<2x64xf32>
      tpu.vector_store %arg8[%c0_13, %c0_14], %17 {strides = array<i32>} : memref<2x64xf32, #tpu.memory_space<vmem>>, vector<2x64xf32>,
    } else {
    }
    %c0 = arith.constant 0 : index
    %c0_1 = arith.constant 0 : index
    %3 = vector.load %arg3[%c0, %c0_1] : memref<64x4xf32, #tpu.memory_space<vmem>>, vector<64x4xf32>
    %4 = vector.shape_cast %3 : vector<64x4xf32> to vector<1x64x4xf32>
    %5 = vector.broadcast %4 : vector<1x64x4xf32> to vector<2x64x4xf32>
    %c0_2 = arith.constant 0 : index
    %c0_3 = arith.constant 0 : index
    %c0_4 = arith.constant 0 : index
    %6 = vector.load %arg2[%c0_2, %c0_3, %c0_4] : memref<2x4x128xf32, #tpu.memory_space<vmem>>, vector<2x4x128xf32>
    %cst = arith.constant dense<0.000000e+00> : vector<2x64x128xf32>
    %7 = tpu.matmul %5, %6, %cst {dimension_numbers = #tpu.dot_dimension_numbers<[2], [1], [1], [2], [0, 0, 0, 1, 1, 2], [0], [0]>} : vector<2x64x4xf32>, vector<2x4x128xf32>, vector<2x64x128xf32> -> vector<2x64x128xf32>
    %cst_5 = arith.constant 0.000000e+00 : f32
    %8 = vector.broadcast %cst_5 : f32 to vector<2x64x128xf32>
    %9 = arith.maximumf %7, %8 : vector<2x64x128xf32>
    %c0_6 = arith.constant 0 : index
    %c0_7 = arith.constant 0 : index
    %10 = vector.load %arg8[%c0_6, %c0_7] : memref<2x64xf32, #tpu.memory_space<vmem>>, vector<2x64xf32>
    %cst_8 = arith.constant dense<0.000000e+00> : vector<2x64xf32>
    %11 = vector.multi_reduction <add>, %9, %cst_8 [2] : vector<2x64x128xf32> to vector<2x64xf32>
    %12 = arith.addf %10, %11 : vector<2x64xf32>
    %c0_9 = arith.constant 0 : index
    %c0_10 = arith.constant 0 : index
    %13 = vector.load %arg8[%c0_9, %c0_10] : memref<2x64xf32, #tpu.memory_space<vmem>>, vector<2x64xf32>
    tpu.vector_store %arg8[%c0_9, %c0_10], %12 {strides = array<i32>} : memref<2x64xf32, #tpu.memory_space<vmem>>, vector<2x64xf32>,
    %c1_i32 = arith.constant 1 : i32
    %14 = arith.cmpi eq, %arg1, %c1_i32 : i32
    %15 = arith.extui %14 : i1 to i32
    %c0_i32_11 = arith.constant 0 : i32
    %16 = arith.cmpi ne, %15, %c0_i32_11 : i32
    scf.if %16 {
      %c0_12 = arith.constant 0 : index
      %c0_13 = arith.constant 0 : index
      %17 = vector.load %arg8[%c0_12, %c0_13] : memref<2x64xf32, #tpu.memory_space<vmem>>, vector<2x64xf32>
      %c0_14 = arith.constant 0 : index
      %c0_15 = arith.constant 0 : index
      %18 = vector.load %arg4[%c0_14, %c0_15] : memref<64x128xf32, #tpu.memory_space<vmem>>, vector<64x128xf32>
      %cst_16 = arith.constant dense<0.000000e+00> : vector<2x128xf32>
      %19 = tpu.matmul %17, %18, %cst_16 {dimension_numbers = #tpu.dot_dimension_numbers<[1], [0], [0], [1], [0, 0, 1, 1], [], []>} : vector<2x64xf32>, vector<64x128xf32>, vector<2x128xf32> -> vector<2x128xf32>
      %cst_17 = arith.constant 0.000000e+00 : f32
      %20 = vector.broadcast %cst_17 : f32 to vector<2x128xf32>
      %21 = arith.maximumf %19, %20 : vector<2x128xf32>
      %c0_18 = arith.constant 0 : index
      %c0_19 = arith.constant 0 : index
      %22 = vector.load %arg7[%c0_18, %c0_19] : memref<2x128xf32, #tpu.memory_space<vmem>>, vector<2x128xf32>
      tpu.vector_store %arg7[%c0_18, %c0_19], %21 {strides = array<i32>} : memref<2x128xf32, #tpu.memory_space<vmem>>, vector<2x128xf32>,
      %23 = arith.mulf %21, %21 : vector<2x128xf32>
      %cst_20 = arith.constant dense<0.000000e+00> : vector<2xf32>
      %24 = vector.multi_reduction <add>, %23, %cst_20 [1] : vector<2x128xf32> to vector<2xf32>
      %25 = vector.shape_cast %24 : vector<2xf32> to vector<2x1xf32>
      %cst_21 = arith.constant 1.000000e-24 : f32
      %26 = vector.broadcast %cst_21 : f32 to vector<2x1xf32>
      %27 = arith.maximumf %25, %26 : vector<2x1xf32>
      %28 = math.rsqrt %27 : vector<2x1xf32>
      %29 = vector.broadcast %28 : vector<2x1xf32> to vector<2x128xf32>
      %30 = arith.mulf %21, %29 : vector<2x128xf32>
      %c0_22 = arith.constant 0 : index
      %c0_23 = arith.constant 0 : index
      %31 = vector.load %arg5[%c0_22, %c0_23] : memref<128x128xf32, #tpu.memory_space<vmem>>, vector<128x128xf32>
      %cst_24 = arith.constant dense<0.000000e+00> : vector<2x128xf32>
      %32 = tpu.matmul %30, %31, %cst_24 {dimension_numbers = #tpu.dot_dimension_numbers<[1], [0], [0], [1], [0, 0, 1, 1], [], []>} : vector<2x128xf32>, vector<128x128xf32>, vector<2x128xf32> -> vector<2x128xf32>
      %c0_25 = arith.constant 0 : index
      %c0_26 = arith.constant 0 : index
      %33 = vector.load %arg6[%c0_25, %c0_26] : memref<2x128xf32, #tpu.memory_space<vmem>>, vector<2x128xf32>
      tpu.vector_store %arg6[%c0_25, %c0_26], %32 {strides = array<i32>} : memref<2x128xf32, #tpu.memory_space<vmem>>, vector<2x128xf32>,
    } else {
    }
    return
  }
  func.func @transform_0(%arg0: i32, %arg1: i32) -> (i32, i32, i32) {
    %c0_i32 = arith.constant 0 : i32
    %c0_i32_0 = arith.constant 0 : i32
    return %arg0, %c0_i32, %arg1 : i32, i32, i32
  }
  func.func @transform_1(%arg0: i32, %arg1: i32) -> (i32, i32) {
    %c0_i32 = arith.constant 0 : i32
    %c0_i32_0 = arith.constant 0 : i32
    %c0_i32_1 = arith.constant 0 : i32
    return %c0_i32, %c0_i32_0 : i32, i32
  }
  func.func @transform_2(%arg0: i32, %arg1: i32) -> (i32, i32) {
    %c0_i32 = arith.constant 0 : i32
    %c0_i32_0 = arith.constant 0 : i32
    %c0_i32_1 = arith.constant 0 : i32
    return %c0_i32, %c0_i32_0 : i32, i32
  }
  func.func @transform_3(%arg0: i32, %arg1: i32) -> (i32, i32) {
    %c0_i32 = arith.constant 0 : i32
    %c0_i32_0 = arith.constant 0 : i32
    %c0_i32_1 = arith.constant 0 : i32
    return %c0_i32, %c0_i32_0 : i32, i32
  }
  func.func @transform_4(%arg0: i32, %arg1: i32) -> (i32, i32) {
    %c0_i32 = arith.constant 0 : i32
    %c0_i32_0 = arith.constant 0 : i32
    return %arg0, %c0_i32 : i32, i32
  }
  func.func @transform_5(%arg0: i32, %arg1: i32) -> (i32, i32) {
    %c0_i32 = arith.constant 0 : i32
    %c0_i32_0 = arith.constant 0 : i32
    return %arg0, %c0_i32 : i32, i32
  }
}

</mosaic_0001>

<bundles_post_ra>
// kernel: tpu_custom_call.1
= control target key start
LH: loop header
LB: loop body
LE: loop exit
PB: predicated region body
PF: predicated region fallthrough
CT: control target
= control target key end

     0   :  { %11 = vsyncpa [#allocation4], 0  ;;  %s1790_s0 = inlined_call_operand.hbm [shape: f32[2,4,256], index: 0, kind: input, shape index: {}]   ;;  %s1791_s1 = inlined_call_operand.vmem [shape: f32[64,4], index: 1, kind: input, shape index: {}]   ;;  %s1792_s2 = inlined_call_operand.vmem [shape: f32[64,128], index: 2, kind: input, shape index: {}]   ;;  %s1793_s3 = inlined_call_operand.hbm [shape: f32[128,128], index: 3, kind: input, shape index: {}]   ;;  %s1794_s4 = inlined_call_operand.hbm [shape: f32[2,128], index: 4, kind: output, shape index: {0}]   ;;  %s1795_s5 = inlined_call_operand.hbm [shape: f32[2,128], index: 5, kind: output, shape index: {1}]  }
   0x1   :  { %13 = vsyncpa [#allocation4 + $0x1], 0 }
   0x2   :  { %14 = vsyncpa [#allocation7], 0 }
   0x3   :  { %15 = vsyncpa [#allocation5], 0 }
   0x4   :  { %16 = vsyncpa [#allocation10], 0  ;;  %s1491_s18 = smov 0   ;;  %s1493_s19 = smov 0  }
   0x5   :  { %s1495_s20 = smov 0   ;;  %s1497_s21 = smov 0  }
   0x6   :  { %s1499_s22 = smov 0   ;;  %s1501_s23 = smov 0  }
   0x7 LB: > { %s987_s24 = sadd.s32 4294967295, %s1447_s23   ;;  %p50_p0 = scmp.ne.s32.totalorder %s1435_s20, %s1431_s19  ;;  %s1447_s23 = sphi %s1501_s23, %s22_s23   ;;  %s1443_s22 = sphi %s1499_s22, %s1815_s22   ;;  %s1439_s21 = sphi %s1497_s21, %s1814_s21   ;;  %s1435_s20 = sphi %s1495_s20, %s1813_s20   ;;  %s1431_s19 = sphi %s1493_s19, %s1812_s19   ;;  %s1427_s18 = sphi %s1491_s18, %s1811_s18  }
   0x8   : > { %p51_p1 = scmp.eq.s32.totalorder %s1447_s23, 0  ;;  %p56_p2 = scmp.ne.s32.totalorder %s1431_s19, %s1427_s18 }
   0x9   : > { %p1526_p3 = scmp.eq.s32.totalorder %s987_s24, 0  ;;  %p988_p4 = scmp.ge.s32.totalorder %s1447_s23, 1 }
   0xa   : > { %p52_p5 = por %p51_p1, %p50_p0  ;;  %p182_p6 = scmp.lt.s32.totalorder %s1447_s23, 3 }
   0xb   : > { %s1801_s25 = scalar_select %p1526_p3, 1, 0 }
   0xc   : > { %p1534_p7 = por %p1526_p3, %p56_p2  ;;  %p1538_p8 = pnand %p988_p4, %p182_p6 }
   0xd   : > { %s1449_s28 = smov [#allocation6]   ;;  %p1208_p11 = scmp.lt.s32.totalorder %s1447_s23, 2 }
   0xe   : > { %s1802_s26 = scalar_select %p1534_p7, 1, 0 }
   0xf   : > { %s1803_s27 = scalar_select %p1538_p8, 1, 0 }
  0x10   : > { %s200_s29 = sshll.u32 %s1449_s28, 4  ;;  %p1199_p9 = pneg %p1538_p8  ;;  %s201_s29 = int_to_ptr.vmem [resolvable:$true] %s200_s29 }
  0x11   : > { %s43_s6 = sadd.s32 1, %s1435_s20  ;;  %p1552_p12 = pnand %p1208_p11, %p52_p5 }
  0x12   : > { %p1546_p10 = pnand %p1199_p9, %p1526_p3  ;;  %s1275_s10 = scalar_lea.hbm %s1793_s3, 2048 }
  0x13   : > { %s1805_s7 = scalar_select %p1552_p12, 1, 0 }
  0x14   : > { %p1276_p13 = scmp.ne.s32.totalorder %s1793_s3, %s1275_s10  ;;  %p1277_p0 = pneg %p1546_p10 }
  0x15   : > { %p1282_p4 = scmp.lt.u32.totalorder %s1275_s10, %s1793_s3 }
  0x16   : > { %p1278_p1 = pnand %p1277_p0, %p1276_p13 }
  0x18   : > { %p1279_p2 = pneg %p1278_p1 }
  0x1a   : > { %p1284_p5 = pnand %p1282_p4, %p1279_p2 }
  0x1c   : > { %1287 = shalt.err (!%p1284_p5)
}
  0x1d   : > { %s1288_s15 = scalar_lea.vmem %s201_s29, 2048  ;;  %p1296_p3 = scmp.lt.s32.totalorder %s201_s29, %s201_s29 }
  0x1e   : > { %p1289_p6 = scmp.ne.s32.totalorder %s201_s29, %s1288_s15  ;;  %p1297_p7 = scmp.lt.s32.totalorder %s1288_s15, %s1288_s15 }
  0x20   : > { %p1291_p9 = pnand %p1289_p6, %p1277_p0  ;;  %p1298_p8 = por %p1297_p7, %p1296_p3 }
  0x22   : > { %p1292_p11 = pneg %p1291_p9 }
  0x24   : > { %p1299_p12 = pnand %p1298_p8, %p1292_p11 }
  0x26   : > { %1302 = shalt.err (!%p1299_p12)
}
  0x27   : > { %s1450_s16 = smov 128   ;;  %s1451_s17 = smov 8  }
  0x28   : > { %1202 = dma.hbm_to_vmem [thread:$0]  (!%p1546_p10), %s1793_s3, 2048, %s201_s29, [#allocation7], %s1450_s16, %s1450_s16, %s1451_s17  }
  0x29   : > { %s31_s8 = sadd.s32 1, %s1443_s22  ;;  %s214_s9 = sand.u32 1, %s1435_s20  }
  0x2a   : > { %p32_p3 = scmp.ge.s32.totalorder %s31_s8, 2  ;;  %s991_s10 = sshll.u32 %s214_s9, 3 }
  0x2b   : > { %s992_s11 = sshll.u32 %s1443_s22, 6  ;;  %s218_s29 = scalar_lea.vmem [#allocation3], %s991_s10 }
  0x2c   : > { %s1817_s8 = smov (%p32_p3, %s31_s8), 0  ;;  %s1582_s30 = scalar_lea.hbm %s1790_s0, %s992_s11 }
  0x2d   : > { %s39_s14 = ssub.s32 %s1443_s22, %s1817_s8  ;;  %s227_s15 = sshll.u32 %s218_s29, 4  ;;  %s1586_s15 = int_to_ptr.vmem [resolvable:$true] %s227_s15 }
  0x2e   : > { %p41_p7 = scmp.eq.s32.totalorder %s39_s14, 0  ;;  %s1593_s18 = scalar_lea.sflag [#allocation4], %s214_s9 }
  0x2f   : > { %s1303_s28 = scalar_lea.hbm %s1582_s30, 128  ;;  %p1806_p10 = scmp.ne.s32.totalorder %s1805_s7, 0 }
  0x30   : > { %s1591_s17 = scalar_select %p41_p7, %s1435_s20, %s43_s6  }
  0x31   : > { %p1304_p8 = scmp.ne.s32.totalorder %s1582_s30, %s1303_s28  ;;  %p1305_p12 = pneg %p1806_p10 }
  0x32   : > { %s1308_s10 = scalar_lea.hbm %s1790_s0, 256  ;;  %p1309_p1 = scmp.lt.u32.totalorder %s1582_s30, %s1790_s0 }
  0x33   : > { %p1306_p13 = pnand %p1305_p12, %p1304_p8  ;;  %p1310_p2 = scmp.lt.u32.totalorder %s1308_s10, %s1303_s28 }
  0x34   : > { %p1312_p5 = scmp.lt.u32.totalorder %s1303_s28, %s1582_s30 }
  0x35   : > { %p1307_p0 = pneg %p1306_p13  ;;  %p1311_p4 = por %p1310_p2, %p1309_p1 }
  0x37   : > { %p1313_p6 = por %p1312_p5, %p1311_p4 }
  0x39   : > { %p1314_p9 = pnand %p1313_p6, %p1307_p0 }
  0x3b   : > { %1317 = shalt.err (!%p1314_p9)
}
  0x3c   : > { %s1318_s6 = scalar_lea.vmem %s1586_s15, 128  ;;  %s1452_s9 = smov [#allocation3]  }
  0x3d   : > { %p1319_p11 = scmp.ne.s32.totalorder %s1586_s15, %s1318_s6  ;;  %s1323_s29 = sshll.u32 %s1452_s9, 4  ;;  %s1324_s29 = int_to_ptr.vmem [resolvable:$false] %s1323_s29 }
  0x3e   : > { %s1325_s11 = scalar_lea.vmem %s1324_s29, 256  ;;  %p1326_p8 = scmp.lt.s32.totalorder %s1586_s15, %s1324_s29 }
  0x3f   : > { %p1321_p3 = pnand %p1319_p11, %p1305_p12  ;;  %p1327_p13 = scmp.lt.s32.totalorder %s1325_s11, %s1318_s6 }
  0x41   : > { %p1322_p7 = pneg %p1321_p3  ;;  %p1328_p1 = por %p1327_p13, %p1326_p8 }
  0x43   : > { %p1329_p2 = pnand %p1328_p1, %p1322_p7 }
  0x45   : > { %1332 = shalt.err (!%p1329_p2)
}
  0x46   : > { %s1453_s28 = smov 64   ;;  %s1454_s12 = smov 4  }
  0x47   : > { %1206 = dma.hbm_to_vmem [thread:$0]  (!%p1806_p10), %s1582_s30, 128, %s1586_s15, %s1593_s18, %s1450_s16, %s1453_s28, %s1454_s12  }
  0x48   : > { %p1807_p12 = scmp.ne.s32.totalorder %s1803_s27, 0 }
  0x49   : > { %s241_s10 = sand.u32 (!%p1807_p12), 1, %s1431_s19   ;;  %p1808_p0 = scmp.ne.s32.totalorder (!%p1807_p12), %s1802_s26, 0 }
  0x4a   : > { %239 = sbr.rel (%p1807_p12) target bundleno = 1131 (0x46b), region = 36  ;;  %s994_s13 = sshll.u32 (!%p1807_p12), %s241_s10, 3 }
  0x4b   : > { %s242_s14 = scalar_lea.sflag (!%p1807_p12), [#allocation4], %s241_s10  ;;  %s245_s6 = scalar_lea.vmem (!%p1807_p12), [#allocation3], %s994_s13 }
  0x51   : > { %1410 = dma.done.wait (%p1808_p0), %s242_s14, 128  }
  0x52   : > { %1412 = vsyncadd (%p1808_p0), %s242_s14, 4294967168  ;;  %p1809_p4 = scmp.ne.s32.totalorder %s1801_s25, 0 }
  0x54   : > { %1414 = dma.done.wait (%p1809_p4), [#allocation7], 2048  }
  0x55   : > { %1416 = vsyncadd (%p1809_p4), [#allocation7], 4294965248  ;;  %p996_p10 = scmp.ne.s32.totalorder %s1439_s21, 0 }
  0x56   : > { %vm276_vm0 = vcmask (!%p996_p10), 517120   ;;  %v1455_v0 = vmov (!%p996_p10), 0.0  }
  0x57   : > { %275 = sbr.rel (%p996_p10) target bundleno = 94 (0x5e), region = 48  ;;  %277 = vst.msk [vmem:[#allocation2] sm:$0x3] (!%p996_p10), %vm276_vm0, %v1455_v0 }
  0x5e PF: > { %v286_v1 = vld [vmem:[%s245_s6] sm:$0xf]  ;;  %vm313_vm1 = vcmask 1043456   ;;  %v287_v2 = vld [vmem:[%s245_s6 + $0x4] sm:$0xf]  ;;  %vm288_vm2 = vcmask 31744   ;;  %v595_v45 = vlaneseq }
  0x5f   : > { %v278_v3 = vld [vmem:[%s1791_s1] sm:$0xff]  ;;  %1067 = vmatprep.subr.msk.mxu0 %vm313_vm1, %v286_v1  ;;  %1081 = vmatprep.subr.msk.mxu1 %vm313_vm1, %v287_v2  ;;  %v279_v4 = vld [vmem:[%s1791_s1 + $0x8] sm:$0xff]  ;;  %v280_v5 = vld [vmem:[%s1791_s1 + $0x10] sm:$0xff]  ;;  %vm606_vm3 = vcmask 130112   ;;  %vm613_vm4 = vcmask 195712   ;;  %vm620_vm5 = vcmask 261312  }
  0x60   : > { %1068 = vmatpush3.msk.msra.mxu0 %vm313_vm1, %v286_v1  ;;  %1069 = vmatprep.mubr.msk.f32.mxu0 %vm288_vm2, %v278_v3  ;;  %v281_v6 = vld [vmem:[%s1791_s1 + $0x18] sm:$0xff]  ;;  %v282_v7 = vld [vmem:[%s1791_s1 + $0x20] sm:$0xff]  ;;  %v283_v8 = vld [vmem:[%s1791_s1 + $0x28] sm:$0xff]  ;;  %v596_v48 = vand.u32 127, %v595_v45  ;;  %v598_v52 = vshrl.u32 %v595_v45, 7  ;;  %vm627_vm6 = vcmask 326912  }
  0x61   : > { %1082 = vmatpush3.msk.msra.mxu1 %vm313_vm1, %v287_v2  ;;  %1083 = vmatprep.mubr.msk.f32.mxu1 %vm288_vm2, %v278_v3  ;;  %v284_v9 = vld [vmem:[%s1791_s1 + $0x30] sm:$0xff]  ;;  %v285_v10 = vld [vmem:[%s1791_s1 + $0x38] sm:$0xff]  ;;  %vm634_vm7 = vcmask 392512   ;;  %vm641_vm8 = vcmask 458112   ;;  %vm648_vm9 = vcmask 523712   ;;  %vm689_vm10 = vcmask 1041409  }
  0x62   : > { %1070 = vmatmul.mubr.msk.f32.vlgmr.msra.gmra.mrb[0].mxu0 %vm288_vm2, %v279_v4  ;;  %1084 = vmatmul.mubr.msk.f32.vlgmr.msra.gmra.mrb[0].mxu1 %vm288_vm2, %v279_v4  ;;  %v608_v51 = vadd.s32 4294967280, %v596_v48  ;;  %v601_v53 = vadd.s32 4294967288, %v596_v48  ;;  %v599_v56 = vsub.s32 %v596_v48, %v598_v52  ;;  %v615_v57 = vadd.s32 4294967272, %v596_v48  ;;  %p1015_p5 = scmp.ne.s32.totalorder %s1439_s21, 1 }
  0x63   : > { %1072 = vmatprep.mubr.msk.f32.mxu0 %vm288_vm2, %v280_v5  ;;  %1086 = vmatprep.mubr.msk.f32.mxu1 %vm288_vm2, %v280_v5  ;;  %v622_v59 = vadd.s32 4294967264, %v596_v48  ;;  %v636_v1 = vadd.s32 4294967248, %v596_v48  ;;  %vm693_vm11 = vcmask 517120   ;;  %vm1457_vm12 = vmmov (!%p1015_p5), 0  }
  0x64   : > { %v611_v58 = vsub.s32 %v608_v51, %v598_v52  ;;  %v604_v60 = vsub.s32 %v601_v53, %v598_v52  ;;  %v618_v2 = vsub.s32 %v615_v57, %v598_v52  ;;  %v703_v51 = vld [vmem:[%s1792_s2 + $0x18] sm:$0xff] (!%p1015_p5)  ;;  %v706_v57 = vld [vmem:[%s1792_s2 + $0x30] sm:$0xff] (!%p1015_p5)  ;;  %vm708_vm13 = vcmask (!%p1015_p5), 523264  }
  0x65   : > { %v625_v5 = vsub.s32 %v622_v59, %v598_v52  ;;  %vm785_vm14 = vcmask (!%p1015_p5), 1041408  }
  0x66   : > { %1073 = vmatmul.mubr.msk.f32.gmra.mrb[2].mxu0 %vm288_vm2, %v281_v6  ;;  %1087 = vmatmul.mubr.msk.f32.gmra.mrb[2].mxu1 %vm288_vm2, %v281_v6 }
  0x67   : > { %1075 = vmatprep.mubr.msk.f32.mxu0 %vm288_vm2, %v282_v7  ;;  %1089 = vmatprep.mubr.msk.f32.mxu1 %vm288_vm2, %v282_v7 }
  0x6a   : > { %1076 = vmatmul.mubr.msk.f32.gmra.mrb[4].mxu0 %vm288_vm2, %v283_v8  ;;  %1090 = vmatmul.mubr.msk.f32.gmra.mrb[4].mxu1 %vm288_vm2, %v283_v8  ;;  %v629_v8 = vadd.s32 4294967256, %v596_v48 }
  0x6b   : > { %1078 = vmatprep.mubr.msk.f32.mxu0 %vm288_vm2, %v284_v9  ;;  %1092 = vmatprep.mubr.msk.f32.mxu1 %vm288_vm2, %v284_v9 }
  0x6e   : > { %1079 = vmatmul.mubr.msk.f32.gmra.mrb[6].mxu0 %vm288_vm2, %v285_v10  ;;  %1093 = vmatmul.mubr.msk.f32.gmra.mrb[6].mxu1 %vm288_vm2, %v285_v10 }
 0x135   : > { %v1071_v11 = vpop.f32.mrb[0].mxu0  ;;  %v1085_v12 = vpop.f32.mrb[0].mxu1 }
 0x136   : > { %v383_v13 = vpop.f32.mrb[1].mxu0  ;;  %v491_v14 = vpop.f32.mrb[1].mxu1  ;;  %v539_v15 = vmax.f32 %v1085_v12, 0.0  ;;  %v531_v16 = vmax.f32 %v1071_v11, 0.0 }
 0x137   : > { %v530_v19 = vmax.f32 %v383_v13, 0.0  ;;  %v538_v20 = vmax.f32 %v491_v14, 0.0  ;;  %v639_v13 = vsub.s32 %v636_v1, %v598_v52  ;;  %v643_v14 = vadd.s32 4294967240, %v596_v48  ;;  %v702_v48 = vld [vmem:[%s1792_s2 + $0x10] sm:$0xff] (!%p1015_p5) }
 0x138   : > { %565 = vadd.xlane.f32.xlu1 %v539_v15  ;;  %549 = vadd.xlane.f32.xlu0 %v531_v16  ;;  %v1153_v53 = vpack.c.bf16 (!%p1015_p5), %v703_v51, %v702_v48  ;;  %v795_v1 = vld [vmem:[#allocation6 + $0x18] sm:$0xff] (!%p1015_p5) }
 0x139   : > { %v1088_v17 = vpop.f32.mrb[2].mxu1  ;;  %v1074_v18 = vpop.f32.mrb[2].mxu0 }
 0x13a   : > { %v393_v21 = vpop.f32.mrb[3].mxu0  ;;  %v501_v22 = vpop.f32.mrb[3].mxu1  ;;  %v541_v23 = vmax.f32 %v1088_v17, 0.0  ;;  %v533_v24 = vmax.f32 %v1074_v18, 0.0 }
 0x13b   : > { %v532_v31 = vmax.f32 %v393_v21, 0.0  ;;  %v540_v32 = vmax.f32 %v501_v22, 0.0  ;;  %v632_v21 = vsub.s32 %v629_v8, %v598_v52 }
 0x13c   : > { %563 = vadd.xlane.f32.xlu1 %v538_v20  ;;  %547 = vadd.xlane.f32.xlu0 %v530_v19 }
 0x13d   : > { %v1091_v25 = vpop.f32.mrb[4].mxu1  ;;  %v1077_v26 = vpop.f32.mrb[4].mxu0 }
 0x13e   : > { %v403_v27 = vpop.f32.mrb[5].mxu0  ;;  %v511_v28 = vpop.f32.mrb[5].mxu1  ;;  %v543_v35 = vmax.f32 %v1091_v25, 0.0  ;;  %v535_v36 = vmax.f32 %v1077_v26, 0.0  ;;  %v646_v26 = vsub.s32 %v643_v14, %v598_v52  ;;  %v1458_v52 = vmov (!%p1015_p5), 0.0   ;;  %v800_v14 = vld [vmem:[#allocation6 + $0x40] sm:$0xff] (!%p1015_p5) }
 0x13f   : > { %v534_v37 = vmax.f32 %v403_v27, 0.0  ;;  %v542_v38 = vmax.f32 %v511_v28, 0.0  ;;  %1111 = vmatprep.mubr.msk.f32.mxu0 (!%p1015_p5), %vm1457_vm12, %v1458_v52  ;;  %1146 = vmatprep.mubr.msk.f32.mxu1 (!%p1015_p5), %vm1457_vm12, %v1458_v52 }
 0x140   : > { %569 = vadd.xlane.f32.xlu1 %v541_v23  ;;  %553 = vadd.xlane.f32.xlu0 %v533_v24 }
 0x141   : > { %v1080_v29 = vpop.f32.mrb[6].mxu0  ;;  %v1094_v30 = vpop.f32.mrb[6].mxu1 }
 0x142   : > { %v521_v33 = vpop.f32.mrb[7].mxu1  ;;  %v413_v34 = vpop.f32.mrb[7].mxu0  ;;  %v537_v41 = vmax.f32 %v1080_v29, 0.0  ;;  %v545_v42 = vmax.f32 %v1094_v30, 0.0 }
 0x143   : > { %v544_v39 = vmax.f32 %v521_v33, 0.0  ;;  %v536_v40 = vmax.f32 %v413_v34, 0.0 }
 0x144   : > { %567 = vadd.xlane.f32.xlu1 %v540_v32  ;;  %551 = vadd.xlane.f32.xlu0 %v532_v31 }
 0x148   : > { %573 = vadd.xlane.f32.xlu1 %v543_v35  ;;  %557 = vadd.xlane.f32.xlu0 %v535_v36 }
 0x14c   : > { %571 = vadd.xlane.f32.xlu1 %v542_v38  ;;  %555 = vadd.xlane.f32.xlu0 %v534_v37 }
 0x150   : > { %575 = vadd.xlane.f32.xlu1 %v544_v39  ;;  %559 = vadd.xlane.f32.xlu0 %v536_v40 }
 0x154   : > { %577 = vadd.xlane.f32.xlu1 %v545_v42  ;;  %561 = vadd.xlane.f32.xlu0 %v537_v41  ;;  %v546_v41 = vld [vmem:[#allocation2] sm:$0x3] }
 0x1c5   : > { %v566_v43 = vpop.xlane.xlu1 %565  ;;  %v550_v44 = vpop.xlane.xlu0 %549 }
 0x1c6   : > { %v657_v6 = vrot.slane %v566_v43, %v604_v60  ;;  %v605_v7 = vrot.slane %v550_v44, %v604_v60 }
 0x1c9   : > { %v564_v46 = vpop.xlane.xlu1 %563  ;;  %v548_v47 = vpop.xlane.xlu0 %547 }
 0x1ca   : > { %v653_v63 = vrot.slane %v564_v46, %v599_v56  ;;  %v600_v0 = vrot.slane %v548_v47, %v599_v56  ;;  %v700_v46 = vld [vmem:[%s1792_s2] sm:$0xff] (!%p1015_p5)  ;;  %v701_v47 = vld [vmem:[%s1792_s2 + $0x8] sm:$0xff] (!%p1015_p5) }
 0x1cc   : > { %v658_v11 = vsel %vm606_vm3, %v657_v6, %v653_v63  ;;  %v607_v12 = vsel %vm606_vm3, %v605_v7, %v600_v0  ;;  %v794_v63 = vld [vmem:[#allocation6 + $0x10] sm:$0xff] (!%p1015_p5)  ;;  %v799_v7 = vld [vmem:[#allocation6 + $0x38] sm:$0xff] (!%p1015_p5) }
 0x1cd   : > { %v570_v49 = vpop.xlane.xlu1 %569  ;;  %v554_v50 = vpop.xlane.xlu0 %553  ;;  %v798_v6 = vld [vmem:[#allocation6 + $0x30] sm:$0xff] (!%p1015_p5) }
 0x1ce   : > { %v667_v19 = vrot.slane %v570_v49, %v618_v2  ;;  %v619_v20 = vrot.slane %v554_v50, %v618_v2  ;;  %v1456_v49 = vmov (!%p1015_p5), 0.0|0.0   ;;  %v1150_v50 = vpack.c.bf16 (!%p1015_p5), %v701_v47, %v700_v46 }
 0x1cf   : > { %1149 = vmatprep.subr.bf16.mxu0 (!%p1015_p5), %v1456_v49  ;;  %1161 = vmatprep.subr.bf16.mxu1 (!%p1015_p5), %v1456_v49  ;;  %v1165_v2 = vpack.c.bf16 (!%p1015_p5), %v795_v1, %v794_v63  ;;  %v1171_v8 = vpack.c.bf16 (!%p1015_p5), %v799_v7, %v798_v6 }
 0x1d0   : > { %1151 = vmatpush3.bf16.msra.mxu0 (!%p1015_p5), %v1150_v50 }
 0x1d1   : > { %v568_v54 = vpop.xlane.xlu1 %567  ;;  %v552_v55 = vpop.xlane.xlu0 %551  ;;  %1152 = vmatprep.subr.bf16.mxu0 (!%p1015_p5), %v1456_v49 }
 0x1d2   : > { %v662_v3 = vrot.slane %v568_v54, %v611_v58  ;;  %v612_v4 = vrot.slane %v552_v55, %v611_v58  ;;  %v704_v54 = vld [vmem:[%s1792_s2 + $0x20] sm:$0xff] (!%p1015_p5)  ;;  %v705_v55 = vld [vmem:[%s1792_s2 + $0x28] sm:$0xff] (!%p1015_p5)  ;;  %v707_v58 = vld [vmem:[%s1792_s2 + $0x38] sm:$0xff] (!%p1015_p5) }
 0x1d3   : > { %v1156_v56 = vpack.c.bf16 (!%p1015_p5), %v705_v55, %v704_v54  ;;  %v1159_v59 = vpack.c.bf16 (!%p1015_p5), %v707_v58, %v706_v57 }
 0x1d4   : > { %v663_v15 = vsel %vm613_vm4, %v662_v3, %v658_v11  ;;  %v614_v16 = vsel %vm613_vm4, %v612_v4, %v607_v12  ;;  %1154 = vmatpush3.bf16.msra.mxu0 (!%p1015_p5), %v1153_v53  ;;  %v796_v3 = vld [vmem:[#allocation6 + $0x20] sm:$0xff] (!%p1015_p5)  ;;  %v797_v4 = vld [vmem:[#allocation6 + $0x28] sm:$0xff] (!%p1015_p5) }
 0x1d5   : > { %v574_v61 = vpop.xlane.xlu1 %573  ;;  %v558_v62 = vpop.xlane.xlu0 %557  ;;  %v668_v24 = vsel %vm620_vm5, %v667_v19, %v663_v15  ;;  %v621_v25 = vsel %vm620_vm5, %v619_v20, %v614_v16  ;;  %1155 = vmatprep.subr.bf16.mxu0 (!%p1015_p5), %v1456_v49  ;;  %v801_v15 = vld [vmem:[#allocation6 + $0x48] sm:$0xff] (!%p1015_p5)  ;;  %v804_v20 = vld [vmem:[#allocation6 + $0x60] sm:$0xff] (!%p1015_p5) }
 0x1d6   : > { %v677_v31 = vrot.slane %v574_v61, %v632_v21  ;;  %v633_v32 = vrot.slane %v558_v62, %v632_v21  ;;  %v792_v61 = vld [vmem:[#allocation6] sm:$0xff] (!%p1015_p5)  ;;  %v793_v62 = vld [vmem:[#allocation6 + $0x8] sm:$0xff] (!%p1015_p5)  ;;  %v1174_v16 = vpack.c.bf16 (!%p1015_p5), %v801_v15, %v800_v14 }
 0x1d7   : > { %v1162_v0 = vpack.c.bf16 (!%p1015_p5), %v793_v62, %v792_v61  ;;  %v805_v21 = vld [vmem:[#allocation6 + $0x68] sm:$0xff] (!%p1015_p5) }
 0x1d8   : > { %1157 = vmatpush3.bf16.msra.mxu0 (!%p1015_p5), %v1156_v56 }
 0x1d9   : > { %v572_v9 = vpop.xlane.xlu1 %571  ;;  %v556_v10 = vpop.xlane.xlu0 %555  ;;  %1158 = vmatprep.subr.bf16.mxu0 (!%p1015_p5), %v1456_v49  ;;  %1163 = vmatpush3.bf16.msra.mxu1 (!%p1015_p5), %v1162_v0 }
 0x1da   : > { %v672_v17 = vrot.slane %v572_v9, %v625_v5  ;;  %v626_v18 = vrot.slane %v556_v10, %v625_v5  ;;  %1164 = vmatprep.subr.bf16.mxu1 (!%p1015_p5), %v1456_v49  ;;  %v1168_v5 = vpack.c.bf16 (!%p1015_p5), %v797_v4, %v796_v3 }
 0x1dc   : > { %v673_v27 = vsel %vm627_vm6, %v672_v17, %v668_v24  ;;  %v628_v28 = vsel %vm627_vm6, %v626_v18, %v621_v25  ;;  %1160 = vmatpush3.bf16.msra.mxu0 (!%p1015_p5), %v1159_v59  ;;  %v802_v17 = vld [vmem:[#allocation6 + $0x50] sm:$0xff] (!%p1015_p5)  ;;  %v803_v18 = vld [vmem:[#allocation6 + $0x58] sm:$0xff] (!%p1015_p5) }
 0x1dd   : > { %v576_v22 = vpop.xlane.xlu1 %575  ;;  %v560_v23 = vpop.xlane.xlu0 %559  ;;  %v678_v35 = vsel %vm634_vm7, %v677_v31, %v673_v27  ;;  %v635_v36 = vsel %vm634_vm7, %v633_v32, %v628_v28  ;;  %1166 = vmatpush3.bf16.msra.mxu1 (!%p1015_p5), %v1165_v2  ;;  %v1177_v19 = vpack.c.bf16 (!%p1015_p5), %v803_v18, %v802_v17  ;;  %v807_v24 = vld [vmem:[#allocation6 + $0x78] sm:$0xff] (!%p1015_p5) }
 0x1de   : > { %v682_v29 = vrot.slane %v576_v22, %v639_v13  ;;  %v640_v30 = vrot.slane %v560_v23, %v639_v13  ;;  %1167 = vmatprep.subr.bf16.mxu1 (!%p1015_p5), %v1456_v49  ;;  %v1180_v22 = vpack.c.bf16 (!%p1015_p5), %v805_v21, %v804_v20  ;;  %v806_v23 = vld [vmem:[#allocation6 + $0x70] sm:$0xff] (!%p1015_p5) }
 0x1df   : > { %v1183_v25 = vpack.c.bf16 (!%p1015_p5), %v807_v24, %v806_v23 }
 0x1e0   : > { %v683_v39 = vsel %vm641_vm8, %v682_v29, %v678_v35  ;;  %v642_v40 = vsel %vm641_vm8, %v640_v30, %v635_v36 }
 0x1e1   : > { %v578_v33 = vpop.xlane.xlu1 %577  ;;  %v562_v34 = vpop.xlane.xlu0 %561  ;;  %1169 = vmatpush3.bf16.msra.mxu1 (!%p1015_p5), %v1168_v5 }
 0x1e2   : > { %v687_v37 = vrot.slane %v578_v33, %v646_v26  ;;  %v647_v38 = vrot.slane %v562_v34, %v646_v26  ;;  %698 = sbr.rel (%p1015_p5) target bundleno = 1083 (0x43b), region = 52  ;;  %1170 = vmatprep.subr.bf16.mxu1 (!%p1015_p5), %v1456_v49 }
 0x1e4   : > { %v688_v42 = vsel %vm648_vm9, %v687_v37, %v683_v39  ;;  %v649_v43 = vsel %vm648_vm9, %v647_v38, %v642_v40 }
 0x1e5   : > { %v690_v44 = vsel %vm689_vm10, %v688_v42, %v649_v43  ;;  %1172 = vmatpush3.bf16.msra.mxu1 (!%p1015_p5), %v1171_v8 }
 0x1e6   : > { %v692_v45 = vadd.f32 %v690_v44, %v546_v41  ;;  %1173 = vmatprep.subr.bf16.mxu1 (!%p1015_p5), %v1456_v49 }
 0x1e8   : > { %694 = vst.msk [vmem:[#allocation2] sm:$0x3] %vm693_vm11, %v692_v45 }
 0x1e9   : > { %1175 = vmatpush3.bf16.msra.mxu1 %v1174_v16 }
 0x1ea   : > { %1176 = vmatprep.subr.bf16.mxu1 %v1456_v49 }
 0x1ed   : > { %1178 = vmatpush3.bf16.msra.mxu1 %v1177_v19 }
 0x1ee   : > { %1179 = vmatprep.subr.bf16.mxu1 %v1456_v49 }
 0x1ef   : > { %v699_v60 = vld [vmem:[#allocation2] sm:$0x3] }
 0x1f0   : > { %1112 = vmatmul.mubr.msk.f32.vlgmr.msra.gmra.mrb[0].mxu0 %vm708_vm13, %v699_v60 }
 0x1f1   : > { %1181 = vmatpush3.bf16.msra.mxu1 %v1180_v22 }
 0x1f2   : > { %1182 = vmatprep.subr.bf16.mxu1 %v1456_v49 }
 0x1f5   : > { %1184 = vmatpush3.bf16.msra.mxu1 %v1183_v25 }
 0x2c3   : > { %v778_v9 = vpop.f32.mrb[0].mxu0 }
 0x2c4   : > { %v782_v10 = vmax.f32 %v778_v9, 0.0  ;;  %v1113_v11 = vpop.f32.mrb[1].mxu0 }
 0x2c6   : > { %783 = vst [vmem:[#allocation9] sm:$0x3] %v782_v10  ;;  %v784_v12 = vmul.f32 %v782_v10, %v782_v10 }
 0x2c8   : > { %v786_v13 = vsel %vm785_vm14, %v784_v12, 0.0 }
 0x2c9   : > { %787 = vadd.xlane.f32.xlu0 %v786_v13 }
 0x356   : > { %v788_v26 = vpop.xlane.xlu0 %787 }
 0x357   : > { %v789_v27 = vmax.f32 %v788_v26, 1e-24 }
 0x359   : > { %1273 = vrsqrt.f32 %v789_v27 }
 0x363   : > { %v1274_v28 = vpop.eup %1273 }
 0x364   : > { %v791_v29 = vmul.f32 %v1274_v28, %v782_v10 }
 0x366   : > { %1147 = vmatmul.mubr.f32.vlgmr.msra.gmra.mrb[0].mxu1 %v791_v29 }
 0x439   : > { %v874_v30 = vpop.f32.mrb[0].mxu1 }
 0x43a   : > { %878 = vst [vmem:[#allocation8] sm:$0x3] %v874_v30  ;;  %v1148_v31 = vpop.f32.mrb[1].mxu1 }
 0x43b PF: > { %p1717_p6 = scmp.eq.s32.totalorder %s987_s24, 1  ;;  %s1459_s14 = smov [#allocation8]  }
 0x43c   : > { %s888_s6 = sshll.u32 %s1459_s14, 4  ;;  %s1460_s27 = smov [#allocation9]   ;;  %s889_s6 = int_to_ptr.vmem [resolvable:$true] %s888_s6 }
 0x43d   : > { %s901_s7 = sshll.u32 %s1460_s27, 4  ;;  %s1333_s26 = scalar_lea.vmem %s889_s6, 32  ;;  %s1721_s7 = int_to_ptr.vmem [resolvable:$true] %s901_s7 }
 0x43e   : > { %p1334_p9 = scmp.ne.s32.totalorder %s889_s6, %s1333_s26  ;;  %p1340_p7 = scmp.lt.s32.totalorder %s889_s6, %s889_s6 }
 0x43f   : > { %p1341_p8 = scmp.lt.s32.totalorder %s1333_s26, %s1333_s26 }
 0x440   : > { %p1335_p11 = pnand %p1334_p9, %p1717_p6 }
 0x441   : > { %p1342_p13 = por %p1341_p8, %p1340_p7 }
 0x442   : > { %p1336_p3 = pneg %p1335_p11 }
 0x444   : > { %p1343_p1 = pnand %p1342_p13, %p1336_p3 }
 0x446   : > { %1346 = shalt.err (!%p1343_p1)
}
 0x447   : > { %s1347_s16 = scalar_lea.hbm %s1794_s4, 32 }
 0x448   : > { %p1348_p2 = scmp.ne.s32.totalorder %s1794_s4, %s1347_s16  ;;  %p1353_p4 = scmp.lt.u32.totalorder %s1347_s16, %s1794_s4 }
 0x44a   : > { %p1349_p12 = pnand %p1348_p2, %p1717_p6 }
 0x44c   : > { %p1350_p0 = pneg %p1349_p12 }
 0x44e   : > { %p1355_p10 = pnand %p1353_p4, %p1350_p0 }
 0x450   : > { %1358 = shalt.err (!%p1355_p10)
}
 0x451   : > { %1192 = dma.vmem_to_hbm [thread:$0]  (%p1717_p6), %s889_s6, 32, %s1794_s4, [#allocation5]  }
 0x452   : > { %s1359_s11 = scalar_lea.vmem %s1721_s7, 32  ;;  %p1366_p3 = scmp.lt.s32.totalorder %s1721_s7, %s1721_s7 }
 0x453   : > { %p1360_p5 = scmp.ne.s32.totalorder %s1721_s7, %s1359_s11  ;;  %p1367_p7 = scmp.lt.s32.totalorder %s1359_s11, %s1359_s11 }
 0x455   : > { %p1361_p9 = pnand %p1360_p5, %p1717_p6  ;;  %p1368_p8 = por %p1367_p7, %p1366_p3 }
 0x457   : > { %p1362_p11 = pneg %p1361_p9 }
 0x459   : > { %p1369_p13 = pnand %p1368_p8, %p1362_p11 }
 0x45b   : > { %1372 = shalt.err (!%p1369_p13)
}
 0x45c   : > { %s1373_s10 = scalar_lea.hbm %s1795_s5, 32 }
 0x45d   : > { %p1374_p1 = scmp.ne.s32.totalorder %s1795_s5, %s1373_s10  ;;  %p1379_p0 = scmp.lt.u32.totalorder %s1373_s10, %s1795_s5 }
 0x45f   : > { %p1375_p2 = pnand %p1374_p1, %p1717_p6 }
 0x461   : > { %p1376_p12 = pneg %p1375_p2 }
 0x463   : > { %p1381_p4 = pnand %p1379_p0, %p1376_p12 }
 0x465   : > { %1384 = shalt.err (!%p1381_p4)
}
 0x466   : > { %1194 = dma.vmem_to_hbm [thread:$0]  (%p1717_p6), %s1721_s7, 32, %s1795_s5, [#allocation10]  }
 0x467   : > { %1418 = dma.done.wait (%p1717_p6), [#allocation5], 32  }
 0x468   : > { %1420 = vsyncadd (%p1717_p6), [#allocation5], 4294967264 }
 0x469   : > { %1422 = dma.done.wait (%p1717_p6), [#allocation10], 32  }
 0x46a   : > { %1424 = vsyncadd (%p1717_p6), [#allocation10], 4294967264 }
 0x46b PF: > { %s22_s23 = sadd.s32 1, %s1447_s23   ;;  %s1811_s18 = smov %s1431_s19 }
 0x46c   : > { %p19_p10 = scmp.ge.s32.totalorder %s22_s23, 4   ;;  %s1812_s19 = smov %s1435_s20 }
 0x46d   : > { %s1813_s20 = smov %s1591_s17  ;;  %s1814_s21 = smov %s1443_s22 }
 0x46e   : > { %s1815_s22 = smov %s1817_s8  ;;  %21 = sbr.rel (!%p19_p10) target bundleno = 7 (0x7), region = 95 }
 0x475   :  { %918 = vsyncpa [#allocation4], 1 }
 0x476   :  { %920 = vsyncpa [#allocation4 + $0x1], 1 }
 0x477   :  { %921 = vsyncpa [#allocation7], 1 }
 0x478   :  { %922 = vsyncpa [#allocation5], 1 }
 0x479   :  { %924 = vsyncpa [#allocation5 + $0x1], 1 }
 0x47a   :  { %925 = vsyncpa [#allocation10], 1 }

// kernel: tpu_custom_call.1
= control target key start
LH: loop header
LB: loop body
LE: loop exit
PB: predicated region body
PF: predicated region fallthrough
CT: control target
= control target key end

     0   :  { %11 = vsyncpa [#allocation4], 0  ;;  %s1790_s0 = inlined_call_operand.hbm [shape: f32[2,4,256], index: 0, kind: input, shape index: {}]   ;;  %s1791_s1 = inlined_call_operand.vmem [shape: f32[64,4], index: 1, kind: input, shape index: {}]   ;;  %s1792_s2 = inlined_call_operand.vmem [shape: f32[64,128], index: 2, kind: input, shape index: {}]   ;;  %s1793_s3 = inlined_call_operand.hbm [shape: f32[128,128], index: 3, kind: input, shape index: {}]   ;;  %s1794_s4 = inlined_call_operand.hbm [shape: f32[2,128], index: 4, kind: output, shape index: {0}]   ;;  %s1795_s5 = inlined_call_operand.hbm [shape: f32[2,128], index: 5, kind: output, shape index: {1}]  }
   0x1   :  { %13 = vsyncpa [#allocation4 + $0x1], 0 }
   0x2   :  { %14 = vsyncpa [#allocation7], 0 }
   0x3   :  { %15 = vsyncpa [#allocation5], 0 }
   0x4   :  { %16 = vsyncpa [#allocation10], 0  ;;  %s1491_s18 = smov 0   ;;  %s1493_s19 = smov 0  }
   0x5   :  { %s1495_s20 = smov 0   ;;  %s1497_s21 = smov 0  }
   0x6   :  { %s1499_s22 = smov 0   ;;  %s1501_s23 = smov 0  }
   0x7 LB: > { %s987_s24 = sadd.s32 4294967295, %s1447_s23   ;;  %p50_p0 = scmp.ne.s32.totalorder %s1435_s20, %s1431_s19  ;;  %s1447_s23 = sphi %s1501_s23, %s22_s23   ;;  %s1443_s22 = sphi %s1499_s22, %s1815_s22   ;;  %s1439_s21 = sphi %s1497_s21, %s1814_s21   ;;  %s1435_s20 = sphi %s1495_s20, %s1813_s20   ;;  %s1431_s19 = sphi %s1493_s19, %s1812_s19   ;;  %s1427_s18 = sphi %s1491_s18, %s1811_s18  }
   0x8   : > { %p51_p1 = scmp.eq.s32.totalorder %s1447_s23, 0  ;;  %p56_p2 = scmp.ne.s32.totalorder %s1431_s19, %s1427_s18 }
   0x9   : > { %p1526_p3 = scmp.eq.s32.totalorder %s987_s24, 0  ;;  %p988_p4 = scmp.ge.s32.totalorder %s1447_s23, 1 }
   0xa   : > { %p52_p5 = por %p51_p1, %p50_p0  ;;  %p182_p6 = scmp.lt.s32.totalorder %s1447_s23, 3 }
   0xb   : > { %s1801_s25 = scalar_select %p1526_p3, 1, 0 }
   0xc   : > { %p1534_p7 = por %p1526_p3, %p56_p2  ;;  %p1538_p8 = pnand %p988_p4, %p182_p6 }
   0xd   : > { %s1449_s28 = smov [#allocation6]   ;;  %p1208_p11 = scmp.lt.s32.totalorder %s1447_s23, 2 }
   0xe   : > { %s1802_s26 = scalar_select %p1534_p7, 1, 0 }
   0xf   : > { %s1803_s27 = scalar_select %p1538_p8, 1, 0 }
  0x10   : > { %s200_s29 = sshll.u32 %s1449_s28, 4  ;;  %p1199_p9 = pneg %p1538_p8  ;;  %s201_s29 = int_to_ptr.vmem [resolvable:$true] %s200_s29 }
  0x11   : > { %s43_s6 = sadd.s32 1, %s1435_s20  ;;  %p1552_p12 = pnand %p1208_p11, %p52_p5 }
  0x12   : > { %p1546_p10 = pnand %p1199_p9, %p1526_p3  ;;  %s1275_s10 = scalar_lea.hbm %s1793_s3, 2048 }
  0x13   : > { %s1805_s7 = scalar_select %p1552_p12, 1, 0 }
  0x14   : > { %p1276_p13 = scmp.ne.s32.totalorder %s1793_s3, %s1275_s10  ;;  %p1277_p0 = pneg %p1546_p10 }
  0x15   : > { %p1282_p4 = scmp.lt.u32.totalorder %s1275_s10, %s1793_s3 }
  0x16   : > { %p1278_p1 = pnand %p1277_p0, %p1276_p13 }
  0x18   : > { %p1279_p2 = pneg %p1278_p1 }
  0x1a   : > { %p1284_p5 = pnand %p1282_p4, %p1279_p2 }
  0x1c   : > { %1287 = shalt.err (!%p1284_p5)
}
  0x1d   : > { %s1288_s15 = scalar_lea.vmem %s201_s29, 2048  ;;  %p1296_p3 = scmp.lt.s32.totalorder %s201_s29, %s201_s29 }
  0x1e   : > { %p1289_p6 = scmp.ne.s32.totalorder %s201_s29, %s1288_s15  ;;  %p1297_p7 = scmp.lt.s32.totalorder %s1288_s15, %s1288_s15 }
  0x20   : > { %p1291_p9 = pnand %p1289_p6, %p1277_p0  ;;  %p1298_p8 = por %p1297_p7, %p1296_p3 }
  0x22   : > { %p1292_p11 = pneg %p1291_p9 }
  0x24   : > { %p1299_p12 = pnand %p1298_p8, %p1292_p11 }
  0x26   : > { %1302 = shalt.err (!%p1299_p12)
}
  0x27   : > { %s1450_s16 = smov 128   ;;  %s1451_s17 = smov 8  }
  0x28   : > { %1202 = dma.hbm_to_vmem [thread:$0]  (!%p1546_p10), %s1793_s3, 2048, %s201_s29, [#allocation7], %s1450_s16, %s1450_s16, %s1451_s17  }
  0x29   : > { %s31_s8 = sadd.s32 1, %s1443_s22  ;;  %s214_s9 = sand.u32 1, %s1435_s20  }
  0x2a   : > { %p32_p3 = scmp.ge.s32.totalorder %s31_s8, 2  ;;  %s991_s10 = sshll.u32 %s214_s9, 3 }
  0x2b   : > { %s992_s11 = sshll.u32 %s1443_s22, 6  ;;  %s218_s29 = scalar_lea.vmem [#allocation3], %s991_s10 }
  0x2c   : > { %s1817_s8 = smov (%p32_p3, %s31_s8), 0  ;;  %s1582_s30 = scalar_lea.hbm %s1790_s0, %s992_s11 }
  0x2d   : > { %s39_s14 = ssub.s32 %s1443_s22, %s1817_s8  ;;  %s227_s15 = sshll.u32 %s218_s29, 4  ;;  %s1586_s15 = int_to_ptr.vmem [resolvable:$true] %s227_s15 }
  0x2e   : > { %p41_p7 = scmp.eq.s32.totalorder %s39_s14, 0  ;;  %s1593_s18 = scalar_lea.sflag [#allocation4], %s214_s9 }
  0x2f   : > { %s1303_s28 = scalar_lea.hbm %s1582_s30, 128  ;;  %p1806_p10 = scmp.ne.s32.totalorder %s1805_s7, 0 }
  0x30   : > { %s1591_s17 = scalar_select %p41_p7, %s1435_s20, %s43_s6  }
  0x31   : > { %p1304_p8 = scmp.ne.s32.totalorder %s1582_s30, %s1303_s28  ;;  %p1305_p12 = pneg %p1806_p10 }
  0x32   : > { %s1308_s10 = scalar_lea.hbm %s1790_s0, 256  ;;  %p1309_p1 = scmp.lt.u32.totalorder %s1582_s30, %s1790_s0 }
  0x33   : > { %p1306_p13 = pnand %p1305_p12, %p1304_p8  ;;  %p1310_p2 = scmp.lt.u32.totalorder %s1308_s10, %s1303_s28 }
  0x34   : > { %p1312_p5 = scmp.lt.u32.totalorder %s1303_s28, %s1582_s30 }
  0x35   : > { %p1307_p0 = pneg %p1306_p13  ;;  %p1311_p4 = por %p1310_p2, %p1309_p1 }
  0x37   : > { %p1313_p6 = por %p1312_p5, %p1311_p4 }
  0x39   : > { %p1314_p9 = pnand %p1313_p6, %p1307_p0 }
  0x3b   : > { %1317 = shalt.err (!%p1314_p9)
}
  0x3c   : > { %s1318_s6 = scalar_lea.vmem %s1586_s15, 128  ;;  %s1452_s9 = smov [#allocation3]  }
  0x3d   : > { %p1319_p11 = scmp.ne.s32.totalorder %s1586_s15, %s1318_s6  ;;  %s1323_s29 = sshll.u32 %s1452_s9, 4  ;;  %s1324_s29 = int_to_ptr.vmem [resolvable:$false] %s1323_s29 }
  0x3e   : > { %s1325_s11 = scalar_lea.vmem %s1324_s29, 256  ;;  %p1326_p8 = scmp.lt.s32.totalorder %s1586_s15, %s1324_s29 }
  0x3f   : > { %p1321_p3 = pnand %p1319_p11, %p1305_p12  ;;  %p1327_p13 = scmp.lt.s32.totalorder %s1325_s11, %s1318_s6 }
  0x41   : > { %p1322_p7 = pneg %p1321_p3  ;;  %p1328_p1 = por %p1327_p13, %p1326_p8 }
  0x43   : > { %p1329_p2 = pnand %p1328_p1, %p1322_p7 }
  0x45   : > { %1332 = shalt.err (!%p1329_p2)
}
  0x46   : > { %s1453_s28 = smov 64   ;;  %s1454_s12 = smov 4  }
  0x47   : > { %1206 = dma.hbm_to_vmem [thread:$0]  (!%p1806_p10), %s1582_s30, 128, %s1586_s15, %s1593_s18, %s1450_s16, %s1453_s28, %s1454_s12  }
  0x48   : > { %p1807_p12 = scmp.ne.s32.totalorder %s1803_s27, 0 }
  0x49   : > { %s241_s10 = sand.u32 (!%p1807_p12), 1, %s1431_s19   ;;  %p1808_p0 = scmp.ne.s32.totalorder (!%p1807_p12), %s1802_s26, 0 }
  0x4a   : > { %239 = sbr.rel (%p1807_p12) target bundleno = 1131 (0x46b), region = 36  ;;  %s994_s13 = sshll.u32 (!%p1807_p12), %s241_s10, 3 }
  0x4b   : > { %s242_s14 = scalar_lea.sflag (!%p1807_p12), [#allocation4], %s241_s10  ;;  %s245_s6 = scalar_lea.vmem (!%p1807_p12), [#allocation3], %s994_s13 }
  0x51   : > { %1410 = dma.done.wait (%p1808_p0), %s242_s14, 128  }
  0x52   : > { %1412 = vsyncadd (%p1808_p0), %s242_s14, 4294967168  ;;  %p1809_p4 = scmp.ne.s32.totalorder %s1801_s25, 0 }
  0x54   : > { %1414 = dma.done.wait (%p1809_p4), [#allocation7], 2048  }
  0x55   : > { %1416 = vsyncadd (%p1809_p4), [#allocation7], 4294965248  ;;  %p996_p10 = scmp.ne.s32.totalorder %s1439_s21, 0 }
  0x56   : > { %vm276_vm0 = vcmask (!%p996_p10), 517120   ;;  %v1455_v0 = vmov (!%p996_p10), 0.0  }
  0x57   : > { %275 = sbr.rel (%p996_p10) target bundleno = 94 (0x5e), region = 48  ;;  %277 = vst.msk [vmem:[#allocation2] sm:$0x3] (!%p996_p10), %vm276_vm0, %v1455_v0 }
  0x5e PF: > { %v286_v1 = vld [vmem:[%s245_s6] sm:$0xf]  ;;  %vm313_vm1 = vcmask 1043456   ;;  %v287_v2 = vld [vmem:[%s245_s6 + $0x4] sm:$0xf]  ;;  %vm288_vm2 = vcmask 31744   ;;  %v595_v45 = vlaneseq }
  0x5f   : > { %v278_v3 = vld [vmem:[%s1791_s1] sm:$0xff]  ;;  %1067 = vmatprep.subr.msk.mxu0 %vm313_vm1, %v286_v1  ;;  %1081 = vmatprep.subr.msk.mxu1 %vm313_vm1, %v287_v2  ;;  %v279_v4 = vld [vmem:[%s1791_s1 + $0x8] sm:$0xff]  ;;  %v280_v5 = vld [vmem:[%s1791_s1 + $0x10] sm:$0xff]  ;;  %vm606_vm3 = vcmask 130112   ;;  %vm613_vm4 = vcmask 195712   ;;  %vm620_vm5 = vcmask 261312  }
  0x60   : > { %1068 = vmatpush3.msk.msra.mxu0 %vm313_vm1, %v286_v1  ;;  %1069 = vmatprep.mubr.msk.f32.mxu0 %vm288_vm2, %v278_v3  ;;  %v281_v6 = vld [vmem:[%s1791_s1 + $0x18] sm:$0xff]  ;;  %v282_v7 = vld [vmem:[%s1791_s1 + $0x20] sm:$0xff]  ;;  %v283_v8 = vld [vmem:[%s1791_s1 + $0x28] sm:$0xff]  ;;  %v596_v48 = vand.u32 127, %v595_v45  ;;  %v598_v52 = vshrl.u32 %v595_v45, 7  ;;  %vm627_vm6 = vcmask 326912  }
  0x61   : > { %1082 = vmatpush3.msk.msra.mxu1 %vm313_vm1, %v287_v2  ;;  %1083 = vmatprep.mubr.msk.f32.mxu1 %vm288_vm2, %v278_v3  ;;  %v284_v9 = vld [vmem:[%s1791_s1 + $0x30] sm:$0xff]  ;;  %v285_v10 = vld [vmem:[%s1791_s1 + $0x38] sm:$0xff]  ;;  %vm634_vm7 = vcmask 392512   ;;  %vm641_vm8 = vcmask 458112   ;;  %vm648_vm9 = vcmask 523712   ;;  %vm689_vm10 = vcmask 1041409  }
  0x62   : > { %1070 = vmatmul.mubr.msk.f32.vlgmr.msra.gmra.mrb[0].mxu0 %vm288_vm2, %v279_v4  ;;  %1084 = vmatmul.mubr.msk.f32.vlgmr.msra.gmra.mrb[0].mxu1 %vm288_vm2, %v279_v4  ;;  %v608_v51 = vadd.s32 4294967280, %v596_v48  ;;  %v601_v53 = vadd.s32 4294967288, %v596_v48  ;;  %v599_v56 = vsub.s32 %v596_v48, %v598_v52  ;;  %v615_v57 = vadd.s32 4294967272, %v596_v48  ;;  %p1015_p5 = scmp.ne.s32.totalorder %s1439_s21, 1 }
  0x63   : > { %1072 = vmatprep.mubr.msk.f32.mxu0 %vm288_vm2, %v280_v5  ;;  %1086 = vmatprep.mubr.msk.f32.mxu1 %vm288_vm2, %v280_v5  ;;  %v622_v59 = vadd.s32 4294967264, %v596_v48  ;;  %v636_v1 = vadd.s32 4294967248, %v596_v48  ;;  %vm693_vm11 = vcmask 517120   ;;  %vm1457_vm12 = vmmov (!%p1015_p5), 0  }
  0x64   : > { %v611_v58 = vsub.s32 %v608_v51, %v598_v52  ;;  %v604_v60 = vsub.s32 %v601_v53, %v598_v52  ;;  %v618_v2 = vsub.s32 %v615_v57, %v598_v52  ;;  %v703_v51 = vld [vmem:[%s1792_s2 + $0x18] sm:$0xff] (!%p1015_p5)  ;;  %v706_v57 = vld [vmem:[%s1792_s2 + $0x30] sm:$0xff] (!%p1015_p5)  ;;  %vm708_vm13 = vcmask (!%p1015_p5), 523264  }
  0x65   : > { %v625_v5 = vsub.s32 %v622_v59, %v598_v52  ;;  %vm785_vm14 = vcmask (!%p1015_p5), 1041408  }
  0x66   : > { %1073 = vmatmul.mubr.msk.f32.gmra.mrb[2].mxu0 %vm288_vm2, %v281_v6  ;;  %1087 = vmatmul.mubr.msk.f32.gmra.mrb[2].mxu1 %vm288_vm2, %v281_v6 }
  0x67   : > { %1075 = vmatprep.mubr.msk.f32.mxu0 %vm288_vm2, %v282_v7  ;;  %1089 = vmatprep.mubr.msk.f32.mxu1 %vm288_vm2, %v282_v7 }
  0x6a   : > { %1076 = vmatmul.mubr.msk.f32.gmra.mrb[4].mxu0 %vm288_vm2, %v283_v8  ;;  %1090 = vmatmul.mubr.msk.f32.gmra.mrb[4].mxu1 %vm288_vm2, %v283_v8  ;;  %v629_v8 = vadd.s32 4294967256, %v596_v48 }
  0x6b   : > { %1078 = vmatprep.mubr.msk.f32.mxu0 %vm288_vm2, %v284_v9  ;;  %1092 = vmatprep.mubr.msk.f32.mxu1 %vm288_vm2, %v284_v9 }
  0x6e   : > { %1079 = vmatmul.mubr.msk.f32.gmra.mrb[6].mxu0 %vm288_vm2, %v285_v10  ;;  %1093 = vmatmul.mubr.msk.f32.gmra.mrb[6].mxu1 %vm288_vm2, %v285_v10 }
 0x135   : > { %v1071_v11 = vpop.f32.mrb[0].mxu0  ;;  %v1085_v12 = vpop.f32.mrb[0].mxu1 }
 0x136   : > { %v383_v13 = vpop.f32.mrb[1].mxu0  ;;  %v491_v14 = vpop.f32.mrb[1].mxu1  ;;  %v539_v15 = vmax.f32 %v1085_v12, 0.0  ;;  %v531_v16 = vmax.f32 %v1071_v11, 0.0 }
 0x137   : > { %v530_v19 = vmax.f32 %v383_v13, 0.0  ;;  %v538_v20 = vmax.f32 %v491_v14, 0.0  ;;  %v639_v13 = vsub.s32 %v636_v1, %v598_v52  ;;  %v643_v14 = vadd.s32 4294967240, %v596_v48  ;;  %v702_v48 = vld [vmem:[%s1792_s2 + $0x10] sm:$0xff] (!%p1015_p5) }
 0x138   : > { %565 = vadd.xlane.f32.xlu1 %v539_v15  ;;  %549 = vadd.xlane.f32.xlu0 %v531_v16  ;;  %v1153_v53 = vpack.c.bf16 (!%p1015_p5), %v703_v51, %v702_v48  ;;  %v795_v1 = vld [vmem:[#allocation6 + $0x18] sm:$0xff] (!%p1015_p5) }
 0x139   : > { %v1088_v17 = vpop.f32.mrb[2].mxu1  ;;  %v1074_v18 = vpop.f32.mrb[2].mxu0 }
 0x13a   : > { %v393_v21 = vpop.f32.mrb[3].mxu0  ;;  %v501_v22 = vpop.f32.mrb[3].mxu1  ;;  %v541_v23 = vmax.f32 %v1088_v17, 0.0  ;;  %v533_v24 = vmax.f32 %v1074_v18, 0.0 }
 0x13b   : > { %v532_v31 = vmax.f32 %v393_v21, 0.0  ;;  %v540_v32 = vmax.f32 %v501_v22, 0.0  ;;  %v632_v21 = vsub.s32 %v629_v8, %v598_v52 }
 0x13c   : > { %563 = vadd.xlane.f32.xlu1 %v538_v20  ;;  %547 = vadd.xlane.f32.xlu0 %v530_v19 }
 0x13d   : > { %v1091_v25 = vpop.f32.mrb[4].mxu1  ;;  %v1077_v26 = vpop.f32.mrb[4].mxu0 }
 0x13e   : > { %v403_v27 = vpop.f32.mrb[5].mxu0  ;;  %v511_v28 = vpop.f32.mrb[5].mxu1  ;;  %v543_v35 = vmax.f32 %v1091_v25, 0.0  ;;  %v535_v36 = vmax.f32 %v1077_v26, 0.0  ;;  %v646_v26 = vsub.s32 %v643_v14, %v598_v52  ;;  %v1458_v52 = vmov (!%p1015_p5), 0.0   ;;  %v800_v14 = vld [vmem:[#allocation6 + $0x40] sm:$0xff] (!%p1015_p5) }
 0x13f   : > { %v534_v37 = vmax.f32 %v403_v27, 0.0  ;;  %v542_v38 = vmax.f32 %v511_v28, 0.0  ;;  %1111 = vmatprep.mubr.msk.f32.mxu0 (!%p1015_p5), %vm1457_vm12, %v1458_v52  ;;  %1146 = vmatprep.mubr.msk.f32.mxu1 (!%p1015_p5), %vm1457_vm12, %v1458_v52 }
 0x140   : > { %569 = vadd.xlane.f32.xlu1 %v541_v23  ;;  %553 = vadd.xlane.f32.xlu0 %v533_v24 }
 0x141   : > { %v1080_v29 = vpop.f32.mrb[6].mxu0  ;;  %v1094_v30 = vpop.f32.mrb[6].mxu1 }
 0x142   : > { %v521_v33 = vpop.f32.mrb[7].mxu1  ;;  %v413_v34 = vpop.f32.mrb[7].mxu0  ;;  %v537_v41 = vmax.f32 %v1080_v29, 0.0  ;;  %v545_v42 = vmax.f32 %v1094_v30, 0.0 }
 0x143   : > { %v544_v39 = vmax.f32 %v521_v33, 0.0  ;;  %v536_v40 = vmax.f32 %v413_v34, 0.0 }
 0x144   : > { %567 = vadd.xlane.f32.xlu1 %v540_v32  ;;  %551 = vadd.xlane.f32.xlu0 %v532_v31 }
 0x148   : > { %573 = vadd.xlane.f32.xlu1 %v543_v35  ;;  %557 = vadd.xlane.f32.xlu0 %v535_v36 }
 0x14c   : > { %571 = vadd.xlane.f32.xlu1 %v542_v38  ;;  %555 = vadd.xlane.f32.xlu0 %v534_v37 }
 0x150   : > { %575 = vadd.xlane.f32.xlu1 %v544_v39  ;;  %559 = vadd.xlane.f32.xlu0 %v536_v40 }
 0x154   : > { %577 = vadd.xlane.f32.xlu1 %v545_v42  ;;  %561 = vadd.xlane.f32.xlu0 %v537_v41  ;;  %v546_v41 = vld [vmem:[#allocation2] sm:$0x3] }
 0x1c5   : > { %v566_v43 = vpop.xlane.xlu1 %565  ;;  %v550_v44 = vpop.xlane.xlu0 %549 }
 0x1c6   : > { %v657_v6 = vrot.slane %v566_v43, %v604_v60  ;;  %v605_v7 = vrot.slane %v550_v44, %v604_v60 }
 0x1c9   : > { %v564_v46 = vpop.xlane.xlu1 %563  ;;  %v548_v47 = vpop.xlane.xlu0 %547 }
 0x1ca   : > { %v653_v63 = vrot.slane %v564_v46, %v599_v56  ;;  %v600_v0 = vrot.slane %v548_v47, %v599_v56  ;;  %v700_v46 = vld [vmem:[%s1792_s2] sm:$0xff] (!%p1015_p5)  ;;  %v701_v47 = vld [vmem:[%s1792_s2 + $0x8] sm:$0xff] (!%p1015_p5) }
 0x1cc   : > { %v658_v11 = vsel %vm606_vm3, %v657_v6, %v653_v63  ;;  %v607_v12 = vsel %vm606_vm3, %v605_v7, %v600_v0  ;;  %v794_v63 = vld [vmem:[#allocation6 + $0x10] sm:$0xff] (!%p1015_p5)  ;;  %v799_v7 = vld [vmem:[#allocation6 + $0x38] sm:$0xff] (!%p1015_p5) }
 0x1cd   : > { %v570_v49 = vpop.xlane.xlu1 %569  ;;  %v554_v50 = vpop.xlane.xlu0 %553  ;;  %v798_v6 = vld [vmem:[#allocation6 + $0x30] sm:$0xff] (!%p1015_p5) }
 0x1ce   : > { %v667_v19 = vrot.slane %v570_v49, %v618_v2  ;;  %v619_v20 = vrot.slane %v554_v50, %v618_v2  ;;  %v1456_v49 = vmov (!%p1015_p5), 0.0|0.0   ;;  %v1150_v50 = vpack.c.bf16 (!%p1015_p5), %v701_v47, %v700_v46 }
 0x1cf   : > { %1149 = vmatprep.subr.bf16.mxu0 (!%p1015_p5), %v1456_v49  ;;  %1161 = vmatprep.subr.bf16.mxu1 (!%p1015_p5), %v1456_v49  ;;  %v1165_v2 = vpack.c.bf16 (!%p1015_p5), %v795_v1, %v794_v63  ;;  %v1171_v8 = vpack.c.bf16 (!%p1015_p5), %v799_v7, %v798_v6 }
 0x1d0   : > { %1151 = vmatpush3.bf16.msra.mxu0 (!%p1015_p5), %v1150_v50 }
 0x1d1   : > { %v568_v54 = vpop.xlane.xlu1 %567  ;;  %v552_v55 = vpop.xlane.xlu0 %551  ;;  %1152 = vmatprep.subr.bf16.mxu0 (!%p1015_p5), %v1456_v49 }
 0x1d2   : > { %v662_v3 = vrot.slane %v568_v54, %v611_v58  ;;  %v612_v4 = vrot.slane %v552_v55, %v611_v58  ;;  %v704_v54 = vld [vmem:[%s1792_s2 + $0x20] sm:$0xff] (!%p1015_p5)  ;;  %v705_v55 = vld [vmem:[%s1792_s2 + $0x28] sm:$0xff] (!%p1015_p5)  ;;  %v707_v58 = vld [vmem:[%s1792_s2 + $0x38] sm:$0xff] (!%p1015_p5) }
 0x1d3   : > { %v1156_v56 = vpack.c.bf16 (!%p1015_p5), %v705_v55, %v704_v54  ;;  %v1159_v59 = vpack.c.bf16 (!%p1015_p5), %v707_v58, %v706_v57 }
 0x1d4   : > { %v663_v15 = vsel %vm613_vm4, %v662_v3, %v658_v11  ;;  %v614_v16 = vsel %vm613_vm4, %v612_v4, %v607_v12  ;;  %1154 = vmatpush3.bf16.msra.mxu0 (!%p1015_p5), %v1153_v53  ;;  %v796_v3 = vld [vmem:[#allocation6 + $0x20] sm:$0xff] (!%p1015_p5)  ;;  %v797_v4 = vld [vmem:[#allocation6 + $0x28] sm:$0xff] (!%p1015_p5) }
 0x1d5   : > { %v574_v61 = vpop.xlane.xlu1 %573  ;;  %v558_v62 = vpop.xlane.xlu0 %557  ;;  %v668_v24 = vsel %vm620_vm5, %v667_v19, %v663_v15  ;;  %v621_v25 = vsel %vm620_vm5, %v619_v20, %v614_v16  ;;  %1155 = vmatprep.subr.bf16.mxu0 (!%p1015_p5), %v1456_v49  ;;  %v801_v15 = vld [vmem:[#allocation6 + $0x48] sm:$0xff] (!%p1015_p5)  ;;  %v804_v20 = vld [vmem:[#allocation6 + $0x60] sm:$0xff] (!%p1015_p5) }
 0x1d6   : > { %v677_v31 = vrot.slane %v574_v61, %v632_v21  ;;  %v633_v32 = vrot.slane %v558_v62, %v632_v21  ;;  %v792_v61 = vld [vmem:[#allocation6] sm:$0xff] (!%p1015_p5)  ;;  %v793_v62 = vld [vmem:[#allocation6 + $0x8] sm:$0xff] (!%p1015_p5)  ;;  %v1174_v16 = vpack.c.bf16 (!%p1015_p5), %v801_v15, %v800_v14 }
 0x1d7   : > { %v1162_v0 = vpack.c.bf16 (!%p1015_p5), %v793_v62, %v792_v61  ;;  %v805_v21 = vld [vmem:[#allocation6 + $0x68] sm:$0xff] (!%p1015_p5) }
 0x1d8   : > { %1157 = vmatpush3.bf16.msra.mxu0 (!%p1015_p5), %v1156_v56 }
 0x1d9   : > { %v572_v9 = vpop.xlane.xlu1 %571  ;;  %v556_v10 = vpop.xlane.xlu0 %555  ;;  %1158 = vmatprep.subr.bf16.mxu0 (!%p1015_p5), %v1456_v49  ;;  %1163 = vmatpush3.bf16.msra.mxu1 (!%p1015_p5), %v1162_v0 }
 0x1da   : > { %v672_v17 = vrot.slane %v572_v9, %v625_v5  ;;  %v626_v18 = vrot.slane %v556_v10, %v625_v5  ;;  %1164 = vmatprep.subr.bf16.mxu1 (!%p1015_p5), %v1456_v49  ;;  %v1168_v5 = vpack.c.bf16 (!%p1015_p5), %v797_v4, %v796_v3 }
 0x1dc   : > { %v673_v27 = vsel %vm627_vm6, %v672_v17, %v668_v24  ;;  %v628_v28 = vsel %vm627_vm6, %v626_v18, %v621_v25  ;;  %1160 = vmatpush3.bf16.msra.mxu0 (!%p1015_p5), %v1159_v59  ;;  %v802_v17 = vld [vmem:[#allocation6 + $0x50] sm:$0xff] (!%p1015_p5)  ;;  %v803_v18 = vld [vmem:[#allocation6 + $0x58] sm:$0xff] (!%p1015_p5) }
 0x1dd   : > { %v576_v22 = vpop.xlane.xlu1 %575  ;;  %v560_v23 = vpop.xlane.xlu0 %559  ;;  %v678_v35 = vsel %vm634_vm7, %v677_v31, %v673_v27  ;;  %v635_v36 = vsel %vm634_vm7, %v633_v32, %v628_v28  ;;  %1166 = vmatpush3.bf16.msra.mxu1 (!%p1015_p5), %v1165_v2  ;;  %v1177_v19 = vpack.c.bf16 (!%p1015_p5), %v803_v18, %v802_v17  ;;  %v807_v24 = vld [vmem:[#allocation6 + $0x78] sm:$0xff] (!%p1015_p5) }
 0x1de   : > { %v682_v29 = vrot.slane %v576_v22, %v639_v13  ;;  %v640_v30 = vrot.slane %v560_v23, %v639_v13  ;;  %1167 = vmatprep.subr.bf16.mxu1 (!%p1015_p5), %v1456_v49  ;;  %v1180_v22 = vpack.c.bf16 (!%p1015_p5), %v805_v21, %v804_v20  ;;  %v806_v23 = vld [vmem:[#allocation6 + $0x70] sm:$0xff] (!%p1015_p5) }
 0x1df   : > { %v1183_v25 = vpack.c.bf16 (!%p1015_p5), %v807_v24, %v806_v23 }
 0x1e0   : > { %v683_v39 = vsel %vm641_vm8, %v682_v29, %v678_v35  ;;  %v642_v40 = vsel %vm641_vm8, %v640_v30, %v635_v36 }
 0x1e1   : > { %v578_v33 = vpop.xlane.xlu1 %577  ;;  %v562_v34 = vpop.xlane.xlu0 %561  ;;  %1169 = vmatpush3.bf16.msra.mxu1 (!%p1015_p5), %v1168_v5 }
 0x1e2   : > { %v687_v37 = vrot.slane %v578_v33, %v646_v26  ;;  %v647_v38 = vrot.slane %v562_v34, %v646_v26  ;;  %698 = sbr.rel (%p1015_p5) target bundleno = 1083 (0x43b), region = 52  ;;  %1170 = vmatprep.subr.bf16.mxu1 (!%p1015_p5), %v1456_v49 }
 0x1e4   : > { %v688_v42 = vsel %vm648_vm9, %v687_v37, %v683_v39  ;;  %v649_v43 = vsel %vm648_vm9, %v647_v38, %v642_v40 }
 0x1e5   : > { %v690_v44 = vsel %vm689_vm10, %v688_v42, %v649_v43  ;;  %1172 = vmatpush3.bf16.msra.mxu1 (!%p1015_p5), %v1171_v8 }
 0x1e6   : > { %v692_v45 = vadd.f32 %v690_v44, %v546_v41  ;;  %1173 = vmatprep.subr.bf16.mxu1 (!%p1015_p5), %v1456_v49 }
 0x1e8   : > { %694 = vst.msk [vmem:[#allocation2] sm:$0x3] %vm693_vm11, %v692_v45 }
 0x1e9   : > { %1175 = vmatpush3.bf16.msra.mxu1 %v1174_v16 }
 0x1ea   : > { %1176 = vmatprep.subr.bf16.mxu1 %v1456_v49 }
 0x1ed   : > { %1178 = vmatpush3.bf16.msra.mxu1 %v1177_v19 }
 0x1ee   : > { %1179 = vmatprep.subr.bf16.mxu1 %v1456_v49 }
 0x1ef   : > { %v699_v60 = vld [vmem:[#allocation2] sm:$0x3] }
 0x1f0   : > { %1112 = vmatmul.mubr.msk.f32.vlgmr.msra.gmra.mrb[0].mxu0 %vm708_vm13, %v699_v60 }
 0x1f1   : > { %1181 = vmatpush3.bf16.msra.mxu1 %v1180_v22 }
 0x1f2   : > { %1182 = vmatprep.subr.bf16.mxu1 %v1456_v49 }
 0x1f5   : > { %1184 = vmatpush3.bf16.msra.mxu1 %v1183_v25 }
 0x2c3   : > { %v778_v9 = vpop.f32.mrb[0].mxu0 }
 0x2c4   : > { %v782_v10 = vmax.f32 %v778_v9, 0.0  ;;  %v1113_v11 = vpop.f32.mrb[1].mxu0 }
 0x2c6   : > { %783 = vst [vmem:[#allocation9] sm:$0x3] %v782_v10  ;;  %v784_v12 = vmul.f32 %v782_v10, %v782_v10 }
 0x2c8   : > { %v786_v13 = vsel %vm785_vm14, %v784_v12, 0.0 }
 0x2c9   : > { %787 = vadd.xlane.f32.xlu0 %v786_v13 }
 0x356   : > { %v788_v26 = vpop.xlane.xlu0 %787 }
 0x357   : > { %v789_v27 = vmax.f32 %v788_v26, 1e-24 }
 0x359   : > { %1273 = vrsqrt.f32 %v789_v27 }
 0x363   : > { %v1274_v28 = vpop.eup %1273 }
 0x364   : > { %v791_v29 = vmul.f32 %v1274_v28, %v782_v10 }
 0x366   : > { %1147 = vmatmul.mubr.f32.vlgmr.msra.gmra.mrb[0].mxu1 %v791_v29 }
 0x439   : > { %v874_v30 = vpop.f32.mrb[0].mxu1 }
 0x43a   : > { %878 = vst [vmem:[#allocation8] sm:$0x3] %v874_v30  ;;  %v1148_v31 = vpop.f32.mrb[1].mxu1 }
 0x43b PF: > { %p1717_p6 = scmp.eq.s32.totalorder %s987_s24, 1  ;;  %s1459_s14 = smov [#allocation8]  }
 0x43c   : > { %s888_s6 = sshll.u32 %s1459_s14, 4  ;;  %s1460_s27 = smov [#allocation9]   ;;  %s889_s6 = int_to_ptr.vmem [resolvable:$true] %s888_s6 }
 0x43d   : > { %s901_s7 = sshll.u32 %s1460_s27, 4  ;;  %s1333_s26 = scalar_lea.vmem %s889_s6, 32  ;;  %s1721_s7 = int_to_ptr.vmem [resolvable:$true] %s901_s7 }
 0x43e   : > { %p1334_p9 = scmp.ne.s32.totalorder %s889_s6, %s1333_s26  ;;  %p1340_p7 = scmp.lt.s32.totalorder %s889_s6, %s889_s6 }
 0x43f   : > { %p1341_p8 = scmp.lt.s32.totalorder %s1333_s26, %s1333_s26 }
 0x440   : > { %p1335_p11 = pnand %p1334_p9, %p1717_p6 }
 0x441   : > { %p1342_p13 = por %p1341_p8, %p1340_p7 }
 0x442   : > { %p1336_p3 = pneg %p1335_p11 }
 0x444   : > { %p1343_p1 = pnand %p1342_p13, %p1336_p3 }
 0x446   : > { %1346 = shalt.err (!%p1343_p1)
}
 0x447   : > { %s1347_s16 = scalar_lea.hbm %s1794_s4, 32 }
 0x448   : > { %p1348_p2 = scmp.ne.s32.totalorder %s1794_s4, %s1347_s16  ;;  %p1353_p4 = scmp.lt.u32.totalorder %s1347_s16, %s1794_s4 }
 0x44a   : > { %p1349_p12 = pnand %p1348_p2, %p1717_p6 }
 0x44c   : > { %p1350_p0 = pneg %p1349_p12 }
 0x44e   : > { %p1355_p10 = pnand %p1353_p4, %p1350_p0 }
 0x450   : > { %1358 = shalt.err (!%p1355_p10)
}
 0x451   : > { %1192 = dma.vmem_to_hbm [thread:$0]  (%p1717_p6), %s889_s6, 32, %s1794_s4, [#allocation5]  }
 0x452   : > { %s1359_s11 = scalar_lea.vmem %s1721_s7, 32  ;;  %p1366_p3 = scmp.lt.s32.totalorder %s1721_s7, %s1721_s7 }
 0x453   : > { %p1360_p5 = scmp.ne.s32.totalorder %s1721_s7, %s1359_s11  ;;  %p1367_p7 = scmp.lt.s32.totalorder %s1359_s11, %s1359_s11 }
 0x455   : > { %p1361_p9 = pnand %p1360_p5, %p1717_p6  ;;  %p1368_p8 = por %p1367_p7, %p1366_p3 }
 0x457   : > { %p1362_p11 = pneg %p1361_p9 }
 0x459   : > { %p1369_p13 = pnand %p1368_p8, %p1362_p11 }
 0x45b   : > { %1372 = shalt.err (!%p1369_p13)
}
 0x45c   : > { %s1373_s10 = scalar_lea.hbm %s1795_s5, 32 }
 0x45d   : > { %p1374_p1 = scmp.ne.s32.totalorder %s1795_s5, %s1373_s10  ;;  %p1379_p0 = scmp.lt.u32.totalorder %s1373_s10, %s1795_s5 }
 0x45f   : > { %p1375_p2 = pnand %p1374_p1, %p1717_p6 }
 0x461   : > { %p1376_p12 = pneg %p1375_p2 }
 0x463   : > { %p1381_p4 = pnand %p1379_p0, %p1376_p12 }
 0x465   : > { %1384 = shalt.err (!%p1381_p4)
}
 0x466   : > { %1194 = dma.vmem_to_hbm [thread:$0]  (%p1717_p6), %s1721_s7, 32, %s1795_s5, [#allocation10]  }
 0x467   : > { %1418 = dma.done.wait (%p1717_p6), [#allocation5], 32  }
 0x468   : > { %1420 = vsyncadd (%p1717_p6), [#allocation5], 4294967264 }
 0x469   : > { %1422 = dma.done.wait (%p1717_p6), [#allocation10], 32  }
 0x46a   : > { %1424 = vsyncadd (%p1717_p6), [#allocation10], 4294967264 }
 0x46b PF: > { %s22_s23 = sadd.s32 1, %s1447_s23   ;;  %s1811_s18 = smov %s1431_s19 }
 0x46c   : > { %p19_p10 = scmp.ge.s32.totalorder %s22_s23, 4   ;;  %s1812_s19 = smov %s1435_s20 }
 0x46d   : > { %s1813_s20 = smov %s1591_s17  ;;  %s1814_s21 = smov %s1443_s22 }
 0x46e   : > { %s1815_s22 = smov %s1817_s8  ;;  %21 = sbr.rel (!%p19_p10) target bundleno = 7 (0x7), region = 95 }
 0x475   :  { %918 = vsyncpa [#allocation4], 1 }
 0x476   :  { %920 = vsyncpa [#allocation4 + $0x1], 1 }
 0x477   :  { %921 = vsyncpa [#allocation7], 1 }
 0x478   :  { %922 = vsyncpa [#allocation5], 1 }
 0x479   :  { %924 = vsyncpa [#allocation5 + $0x1], 1 }
 0x47a   :  { %925 = vsyncpa [#allocation10], 1 }

</bundles_post_ra>
